<compile_context>
chip_gen: v7x
topology: tpu7x:2x2x1
jax: 0.10.0
libtpu: 0.0.40
codegen_flags: <defaults>
</compile_context>

<pallas_src>
import jax
import jax.numpy as jnp
from jax.experimental import pallas as pl
from jax.experimental.pallas import tpu as pltpu


N_EMBEDDING = 1280
H1, H2 = 768, 256
H3 = 64           # logical width of third hidden layer
H3_PAD = 128      # padded to a full MXU / lane tile
N_CLASSES = 1
NC_PAD = 128      # lane-dense kernel output; column 0 is the real logit


def _round_up(x, m):
    return (x + m - 1) // m * m


def _cls_mlp_kernel(x_ref, w1q_ref, s1_ref, b1_ref, w2q_ref, s2_ref, b2_ref,
                    w3_ref, b3_ref, w4_ref, b4_ref, out_ref):
    # x_ref: [Bt, 1280] bf16 CLS activations (CLS slice done in the wrapper).
    x = x_ref[...]

    # Linear(1280, 768) + ReLU.  int8 weight -> bf16 on the VPU (exact since
    # |q| <= 127), per-output-channel scale applied to the f32 accumulator.
    # The cast co-issues with MXU pushes and is correct under megacore
    # sharding (no program_id-gated one-time init needed).
    w1 = w1q_ref[...].astype(jnp.bfloat16)
    h = jnp.dot(x, w1, preferred_element_type=jnp.float32)
    h = jnp.maximum(h * s1_ref[...] + b1_ref[...], 0.0)

    # Linear(768, 256) + ReLU, same int8 scheme.
    w2 = w2q_ref[...].astype(jnp.bfloat16)
    h = jnp.dot(h.astype(jnp.bfloat16), w2, preferred_element_type=jnp.float32)
    h = jnp.maximum(h * s2_ref[...] + b2_ref[...], 0.0)

    # Linear(256, 64 -> 128 padded) + ReLU  (padded lanes stay exactly 0).
    h = jnp.dot(h.astype(jnp.bfloat16), w3_ref[...],
                preferred_element_type=jnp.float32) + b3_ref[...]
    h = jnp.maximum(h, 0.0)

    # Linear(64->128, 1->128 padded): lane-dense bf16 store; col 0 = logit.
    out = jnp.dot(h.astype(jnp.bfloat16), w4_ref[...],
                  preferred_element_type=jnp.float32) + b4_ref[...]
    out_ref[...] = out.astype(out_ref.dtype)


def esm_base_cls_forward(token_representations, params, labels):
    """Eval-branch forward of EsmBaseClsModel given layer-33 representations."""
    B = token_representations.shape[0]

    # CLS extraction + bf16 cast outside the kernel: only [B, 1280] bf16 moves.
    cls = token_representations[:, 0, :].astype(jnp.bfloat16)

    # Batch tiling:
    #  * B <= 512 : single grid step (no per-step overhead), rounded to 16 rows
    #               so the bf16 input block is fully sublane-packed.
    #  * B  > 512 : 512-row tiles — multiple of the 256-wide v6e/v7x MXU and
    #               4x fewer ~0.35us grid steps than 128-row tiles.
    if B <= 512:
        b_tile = max(16, _round_up(B, 16))
    else:
        b_tile = 512
    b_pad = _round_up(B, b_tile)
    if b_pad != B:
        cls = jnp.pad(cls, ((0, b_pad - B), (0, 0)))

    grid = (b_pad // b_tile,)

    def _const(shape):
        # Weights/scales/biases: constant block index -> fetched once, stays
        # VMEM-resident across grid steps.  (On v7x one could additionally use
        # pipeline_mode=pl.Buffered(1) to drop the dead second buffer; not
        # needed at this ~4-5 MiB footprint.)
        return pl.BlockSpec(shape, lambda i: (0, 0))

    # Advisory cost estimate (memory-bound: weight bytes at small B,
    # CLS slab + output at large B).
    mm_macs = N_EMBEDDING * H1 + H1 * H2 + H2 * H3_PAD + H3_PAD * NC_PAD
    flops = 2 * b_pad * mm_macs
    bytes_accessed = (
        N_EMBEDDING * H1 + H1 * H2                   # int8 w1, w2
        + 2 * (H2 * H3_PAD + H3_PAD * NC_PAD)        # bf16 w3, w4
        + 4 * (2 * H1 + 2 * H2 + H3_PAD + NC_PAD)    # f32 scales + biases
        + b_pad * N_EMBEDDING * 2                    # bf16 CLS input
        + b_pad * NC_PAD * 2)                        # bf16 padded output
    cost = pl.CostEstimate(flops=flops, transcendentals=0,
                           bytes_accessed=bytes_accessed)

    logits_pad = pl.pallas_call(
        _cls_mlp_kernel,
        out_shape=jax.ShapeDtypeStruct((b_pad, NC_PAD), jnp.bfloat16),
        grid=grid,
        in_specs=[
            pl.BlockSpec((b_tile, N_EMBEDDING), lambda i: (i, 0)),
            _const((N_EMBEDDING, H1)), _const((1, H1)), _const((1, H1)),
            _const((H1, H2)),          _const((1, H2)), _const((1, H2)),
            _const((H2, H3_PAD)),      _const((1, H3_PAD)),
            _const((H3_PAD, NC_PAD)),  _const((1, NC_PAD)),
        ],
        out_specs=pl.BlockSpec((b_tile, NC_PAD), lambda i: (i, 0)),
        compiler_params=pltpu.CompilerParams(
            dimension_semantics=("parallel",)),
        cost_estimate=cost,
    )(
        cls,
        params["w1q"], params["s1"], params["b1"],
        params["w2q"], params["s2"], params["b2"],
        params["w3"], params["b3"],
        params["w4"], params["b4"],
    )

    # Drop batch padding, take the real logit lane, squeeze(-1), back to f32.
    output_logits = logits_pad[:B, 0].astype(jnp.float32)
    return dict(model_outputs=output_logits, labels=labels)


def init_params(key):
    """Deterministic synthetic classifier-head params.

    w1/w2 are int8 with per-output-channel f32 scales; w3/w4 are bf16 and
    zero-padded to full 128-lane tiles.  Biases are f32.
    """
    ks = jax.random.split(key, 8)

    def lin_f32(kw, kb, fan_in, fan_out):
        bound = 1.0 / jnp.sqrt(jnp.float32(fan_in))
        w = jax.random.uniform(kw, (fan_in, fan_out), jnp.float32, -bound, bound)
        b = jax.random.uniform(kb, (1, fan_out), jnp.float32, -bound, bound)
        return w, b

    def quant_int8(w):
        amax = jnp.max(jnp.abs(w), axis=0, keepdims=True)       # per out-channel
        scale = jnp.where(amax > 0, amax / 127.0, 1.0)
        q = jnp.clip(jnp.round(w / scale), -127, 127).astype(jnp.int8)
        return q, scale.astype(jnp.float32)

    w1, b1 = lin_f32(ks[0], ks[1], N_EMBEDDING, H1)
    w2, b2 = lin_f32(ks[2], ks[3], H1, H2)
    w3, b3 = lin_f32(ks[4], ks[5], H2, H3)
    w4, b4 = lin_f32(ks[6], ks[7], H3, N_CLASSES)

    w1q, s1 = quant_int8(w1)
    w2q, s2 = quant_int8(w2)

    w3p = jnp.pad(w3, ((0, 0), (0, H3_PAD - H3))).astype(jnp.bfloat16)
    b3p = jnp.pad(b3, ((0, 0), (0, H3_PAD - H3)))
    w4p = jnp.pad(w4, ((0, H3_PAD - H3), (0, NC_PAD - N_CLASSES))).astype(jnp.bfloat16)
    b4p = jnp.pad(b4, ((0, 0), (0, NC_PAD - N_CLASSES)))

    return dict(w1q=w1q, s1=s1, b1=b1,
                w2q=w2q, s2=s2, b2=b2,
                w3=w3p, b3=b3p, w4=w4p, b4=b4p)


def _reference_forward(token_representations, params):
    """Pure-JAX f32 reference using the dequantized weights."""
    w1 = params["w1q"].astype(jnp.float32) * params["s1"]
    w2 = params["w2q"].astype(jnp.float32) * params["s2"]
    w3 = params["w3"].astype(jnp.float32)
    w4 = params["w4"].astype(jnp.float32)
    h = token_representations[:, 0, :].astype(jnp.float32)
    h = jnp.maximum(h @ w1 + params["b1"], 0.0)
    h = jnp.maximum(h @ w2 + params["b2"], 0.0)
    h = jnp.maximum(h @ w3 + params["b3"], 0.0)
    out = h @ w4 + params["b4"]
    return out[:, 0]


if __name__ == "__main__":
    key = jax.random.PRNGKey(0)
    k_par, k_tok, k_lab = jax.random.split(key, 3)

    B, L = 2, 8  # small batch / seq length
    params = init_params(k_par)

    # Stand-in for ProteinBert(...)['representations'][33] -> [B, L, 1280]
    token_representations = jax.random.normal(
        k_tok, (B, L, N_EMBEDDING), dtype=jnp.float32
    )
    labels = jax.random.randint(k_lab, (B,), 0, 2).astype(jnp.float32)

    out = esm_base_cls_forward(token_representations, params, labels)
    jax.block_until_ready(out["model_outputs"])

    assert out["model_outputs"].shape == (B,)
    assert out["labels"].shape == (B,)

    # Loose tolerance: kernel uses bf16 activations/weights on the MXU and a
    # bf16 output store; the reference is all-f32 on the dequantized weights.
    ref = _reference_forward(token_representations, params)
    assert jnp.allclose(out["model_outputs"], ref, rtol=0.2, atol=0.2), (
        out["model_outputs"], ref)

    print("KERNEL_OK")
</pallas_src>

<mosaic_0001>
module attributes {stable_mosaic.version = 11 : i64} {
  func.func @_cls_mlp_kernel(%arg0: i32, %arg1: memref<16x1280xbf16, #tpu.memory_space<vmem>>, %arg2: memref<1280x768xi8, #tpu.memory_space<vmem>>, %arg3: memref<1x768xf32, #tpu.memory_space<vmem>>, %arg4: memref<1x768xf32, #tpu.memory_space<vmem>>, %arg5: memref<768x256xi8, #tpu.memory_space<vmem>>, %arg6: memref<1x256xf32, #tpu.memory_space<vmem>>, %arg7: memref<1x256xf32, #tpu.memory_space<vmem>>, %arg8: memref<256x128xbf16, #tpu.memory_space<vmem>>, %arg9: memref<1x128xf32, #tpu.memory_space<vmem>>, %arg10: memref<128x128xbf16, #tpu.memory_space<vmem>>, %arg11: memref<1x128xf32, #tpu.memory_space<vmem>>, %arg12: memref<16x128xbf16, #tpu.memory_space<vmem>>) attributes {dimension_semantics = [#tpu.dimension_semantics<parallel>], iteration_bounds = array<i64: 1>, scalar_prefetch = 0 : i64, scratch_operands = 0 : i64, tpu.core_type = #tpu.core_type<tc>, window_params = [{transform_indices = @transform_0, window_bounds = array<i64: 16, 1280>}, {pipeline_mode = #tpu.pipeline_mode<synchronous>, transform_indices = @transform_1, window_bounds = array<i64: 1280, 768>}, {pipeline_mode = #tpu.pipeline_mode<synchronous>, transform_indices = @transform_2, window_bounds = array<i64: 1, 768>}, {pipeline_mode = #tpu.pipeline_mode<synchronous>, transform_indices = @transform_3, window_bounds = array<i64: 1, 768>}, {pipeline_mode = #tpu.pipeline_mode<synchronous>, transform_indices = @transform_4, window_bounds = array<i64: 768, 256>}, {pipeline_mode = #tpu.pipeline_mode<synchronous>, transform_indices = @transform_5, window_bounds = array<i64: 1, 256>}, {pipeline_mode = #tpu.pipeline_mode<synchronous>, transform_indices = @transform_6, window_bounds = array<i64: 1, 256>}, {pipeline_mode = #tpu.pipeline_mode<synchronous>, transform_indices = @transform_7, window_bounds = array<i64: 256, 128>}, {pipeline_mode = #tpu.pipeline_mode<synchronous>, transform_indices = @transform_8, window_bounds = array<i64: 1, 128>}, {pipeline_mode = #tpu.pipeline_mode<synchronous>, transform_indices = @transform_9, window_bounds = array<i64: 128, 128>}, {pipeline_mode = #tpu.pipeline_mode<synchronous>, transform_indices = @transform_10, window_bounds = array<i64: 1, 128>}, {transform_indices = @transform_11, window_bounds = array<i64: 16, 128>}]} {
    %c0 = arith.constant 0 : index
    %c0_0 = arith.constant 0 : index
    %0 = vector.load %arg1[%c0, %c0_0] : memref<16x1280xbf16, #tpu.memory_space<vmem>>, vector<16x1280xbf16>
    %c0_1 = arith.constant 0 : index
    %c0_2 = arith.constant 0 : index
    %1 = vector.load %arg2[%c0_1, %c0_2] : memref<1280x768xi8, #tpu.memory_space<vmem>>, vector<1280x768xi8>
    %2 = arith.sitofp %1 : vector<1280x768xi8> to vector<1280x768xbf16>
    %cst = arith.constant dense<0.000000e+00> : vector<16x768xf32>
    %3 = tpu.matmul %0, %2, %cst {dimension_numbers = #tpu.dot_dimension_numbers<[1], [0], [0], [1], [0, 0, 1, 1], [], []>} : vector<16x1280xbf16>, vector<1280x768xbf16>, vector<16x768xf32> -> vector<16x768xf32>
    %c0_3 = arith.constant 0 : index
    %c0_4 = arith.constant 0 : index
    %4 = vector.load %arg3[%c0_3, %c0_4] : memref<1x768xf32, #tpu.memory_space<vmem>>, vector<1x768xf32>
    %5 = vector.broadcast %4 : vector<1x768xf32> to vector<16x768xf32>
    %6 = arith.mulf %3, %5 : vector<16x768xf32>
    %c0_5 = arith.constant 0 : index
    %c0_6 = arith.constant 0 : index
    %7 = vector.load %arg4[%c0_5, %c0_6] : memref<1x768xf32, #tpu.memory_space<vmem>>, vector<1x768xf32>
    %8 = vector.broadcast %7 : vector<1x768xf32> to vector<16x768xf32>
    %9 = arith.addf %6, %8 : vector<16x768xf32>
    %cst_7 = arith.constant 0.000000e+00 : f32
    %10 = vector.broadcast %cst_7 : f32 to vector<16x768xf32>
    %11 = arith.maximumf %9, %10 : vector<16x768xf32>
    %c0_8 = arith.constant 0 : index
    %c0_9 = arith.constant 0 : index
    %12 = vector.load %arg5[%c0_8, %c0_9] : memref<768x256xi8, #tpu.memory_space<vmem>>, vector<768x256xi8>
    %13 = arith.sitofp %12 : vector<768x256xi8> to vector<768x256xbf16>
    %14 = arith.truncf %11 : vector<16x768xf32> to vector<16x768xbf16>
    %cst_10 = arith.constant dense<0.000000e+00> : vector<16x256xf32>
    %15 = tpu.matmul %14, %13, %cst_10 {dimension_numbers = #tpu.dot_dimension_numbers<[1], [0], [0], [1], [0, 0, 1, 1], [], []>} : vector<16x768xbf16>, vector<768x256xbf16>, vector<16x256xf32> -> vector<16x256xf32>
    %c0_11 = arith.constant 0 : index
    %c0_12 = arith.constant 0 : index
    %16 = vector.load %arg6[%c0_11, %c0_12] : memref<1x256xf32, #tpu.memory_space<vmem>>, vector<1x256xf32>
    %17 = vector.broadcast %16 : vector<1x256xf32> to vector<16x256xf32>
    %18 = arith.mulf %15, %17 : vector<16x256xf32>
    %c0_13 = arith.constant 0 : index
    %c0_14 = arith.constant 0 : index
    %19 = vector.load %arg7[%c0_13, %c0_14] : memref<1x256xf32, #tpu.memory_space<vmem>>, vector<1x256xf32>
    %20 = vector.broadcast %19 : vector<1x256xf32> to vector<16x256xf32>
    %21 = arith.addf %18, %20 : vector<16x256xf32>
    %cst_15 = arith.constant 0.000000e+00 : f32
    %22 = vector.broadcast %cst_15 : f32 to vector<16x256xf32>
    %23 = arith.maximumf %21, %22 : vector<16x256xf32>
    %24 = arith.truncf %23 : vector<16x256xf32> to vector<16x256xbf16>
    %c0_16 = arith.constant 0 : index
    %c0_17 = arith.constant 0 : index
    %25 = vector.load %arg8[%c0_16, %c0_17] : memref<256x128xbf16, #tpu.memory_space<vmem>>, vector<256x128xbf16>
    %cst_18 = arith.constant dense<0.000000e+00> : vector<16x128xf32>
    %26 = tpu.matmul %24, %25, %cst_18 {dimension_numbers = #tpu.dot_dimension_numbers<[1], [0], [0], [1], [0, 0, 1, 1], [], []>} : vector<16x256xbf16>, vector<256x128xbf16>, vector<16x128xf32> -> vector<16x128xf32>
    %c0_19 = arith.constant 0 : index
    %c0_20 = arith.constant 0 : index
    %27 = vector.load %arg9[%c0_19, %c0_20] : memref<1x128xf32, #tpu.memory_space<vmem>>, vector<1x128xf32>
    %28 = vector.broadcast %27 : vector<1x128xf32> to vector<16x128xf32>
    %29 = arith.addf %26, %28 : vector<16x128xf32>
    %cst_21 = arith.constant 0.000000e+00 : f32
    %30 = vector.broadcast %cst_21 : f32 to vector<16x128xf32>
    %31 = arith.maximumf %29, %30 : vector<16x128xf32>
    %32 = arith.truncf %31 : vector<16x128xf32> to vector<16x128xbf16>
    %c0_22 = arith.constant 0 : index
    %c0_23 = arith.constant 0 : index
    %33 = vector.load %arg10[%c0_22, %c0_23] : memref<128x128xbf16, #tpu.memory_space<vmem>>, vector<128x128xbf16>
    %cst_24 = arith.constant dense<0.000000e+00> : vector<16x128xf32>
    %34 = tpu.matmul %32, %33, %cst_24 {dimension_numbers = #tpu.dot_dimension_numbers<[1], [0], [0], [1], [0, 0, 1, 1], [], []>} : vector<16x128xbf16>, vector<128x128xbf16>, vector<16x128xf32> -> vector<16x128xf32>
    %c0_25 = arith.constant 0 : index
    %c0_26 = arith.constant 0 : index
    %35 = vector.load %arg11[%c0_25, %c0_26] : memref<1x128xf32, #tpu.memory_space<vmem>>, vector<1x128xf32>
    %36 = vector.broadcast %35 : vector<1x128xf32> to vector<16x128xf32>
    %37 = arith.addf %34, %36 : vector<16x128xf32>
    %38 = arith.truncf %37 : vector<16x128xf32> to vector<16x128xbf16>
    %c0_27 = arith.constant 0 : index
    %c0_28 = arith.constant 0 : index
    %39 = vector.load %arg12[%c0_27, %c0_28] : memref<16x128xbf16, #tpu.memory_space<vmem>>, vector<16x128xbf16>
    tpu.vector_store %arg12[%c0_27, %c0_28], %38 {strides = array<i32>} : memref<16x128xbf16, #tpu.memory_space<vmem>>, vector<16x128xbf16>,
    return
  }
  func.func @transform_0(%arg0: i32) -> (i32, i32) {
    %c0_i32 = arith.constant 0 : i32
    %c0_i32_0 = arith.constant 0 : i32
    return %arg0, %c0_i32 : i32, i32
  }
  func.func @transform_1(%arg0: i32) -> (i32, i32) {
    %c0_i32 = arith.constant 0 : i32
    %c0_i32_0 = arith.constant 0 : i32
    %c0_i32_1 = arith.constant 0 : i32
    return %c0_i32, %c0_i32_0 : i32, i32
  }
  func.func @transform_2(%arg0: i32) -> (i32, i32) {
    %c0_i32 = arith.constant 0 : i32
    %c0_i32_0 = arith.constant 0 : i32
    %c0_i32_1 = arith.constant 0 : i32
    return %c0_i32, %c0_i32_0 : i32, i32
  }
  func.func @transform_3(%arg0: i32) -> (i32, i32) {
    %c0_i32 = arith.constant 0 : i32
    %c0_i32_0 = arith.constant 0 : i32
    %c0_i32_1 = arith.constant 0 : i32
    return %c0_i32, %c0_i32_0 : i32, i32
  }
  func.func @transform_4(%arg0: i32) -> (i32, i32) {
    %c0_i32 = arith.constant 0 : i32
    %c0_i32_0 = arith.constant 0 : i32
    %c0_i32_1 = arith.constant 0 : i32
    return %c0_i32, %c0_i32_0 : i32, i32
  }
  func.func @transform_5(%arg0: i32) -> (i32, i32) {
    %c0_i32 = arith.constant 0 : i32
    %c0_i32_0 = arith.constant 0 : i32
    %c0_i32_1 = arith.constant 0 : i32
    return %c0_i32, %c0_i32_0 : i32, i32
  }
  func.func @transform_6(%arg0: i32) -> (i32, i32) {
    %c0_i32 = arith.constant 0 : i32
    %c0_i32_0 = arith.constant 0 : i32
    %c0_i32_1 = arith.constant 0 : i32
    return %c0_i32, %c0_i32_0 : i32, i32
  }
  func.func @transform_7(%arg0: i32) -> (i32, i32) {
    %c0_i32 = arith.constant 0 : i32
    %c0_i32_0 = arith.constant 0 : i32
    %c0_i32_1 = arith.constant 0 : i32
    return %c0_i32, %c0_i32_0 : i32, i32
  }
  func.func @transform_8(%arg0: i32) -> (i32, i32) {
    %c0_i32 = arith.constant 0 : i32
    %c0_i32_0 = arith.constant 0 : i32
    %c0_i32_1 = arith.constant 0 : i32
    return %c0_i32, %c0_i32_0 : i32, i32
  }
  func.func @transform_9(%arg0: i32) -> (i32, i32) {
    %c0_i32 = arith.constant 0 : i32
    %c0_i32_0 = arith.constant 0 : i32
    %c0_i32_1 = arith.constant 0 : i32
    return %c0_i32, %c0_i32_0 : i32, i32
  }
  func.func @transform_10(%arg0: i32) -> (i32, i32) {
    %c0_i32 = arith.constant 0 : i32
    %c0_i32_0 = arith.constant 0 : i32
    %c0_i32_1 = arith.constant 0 : i32
    return %c0_i32, %c0_i32_0 : i32, i32
  }
  func.func @transform_11(%arg0: i32) -> (i32, i32) {
    %c0_i32 = arith.constant 0 : i32
    %c0_i32_0 = arith.constant 0 : i32
    return %arg0, %c0_i32 : i32, i32
  }
}

</mosaic_0001>

<bundles_post_ra>
// kernel: tpu_custom_call.1
= control target key start
LH: loop header
LB: loop body
LE: loop exit
PB: predicated region body
PF: predicated region fallthrough
CT: control target
= control target key end

     0   :  { %16 = vsyncpa [#allocation3], 0  ;;  %s2893_s0 = inlined_call_operand.hbm [shape: bf16[16,1280], index: 0, kind: input, shape index: {}]   ;;  %s2894_s1 = inlined_call_operand.hbm [shape: s8[1280,768], index: 1, kind: input, shape index: {}]   ;;  %s2895_s2 = inlined_call_operand.vmem [shape: f32[1,768], index: 2, kind: input, shape index: {}]   ;;  %s2896_s3 = inlined_call_operand.hbm [shape: f32[1,768], index: 3, kind: input, shape index: {}]   ;;  %s2897_s4 = inlined_call_operand.hbm [shape: s8[768,256], index: 4, kind: input, shape index: {}]   ;;  %s2898_s5 = inlined_call_operand.vmem [shape: f32[1,256], index: 5, kind: input, shape index: {}]   ;;  %s2899_s6 = inlined_call_operand.vmem [shape: f32[1,256], index: 6, kind: input, shape index: {}]   ;;  %s2900_s7 = inlined_call_operand.hbm [shape: bf16[256,128], index: 7, kind: input, shape index: {}]   ;;  %s2901_s8 = inlined_call_operand.vmem [shape: f32[1,128], index: 8, kind: input, shape index: {}]   ;;  %s2902_s9 = inlined_call_operand.hbm [shape: bf16[128,128], index: 9, kind: input, shape index: {}]   ;;  %s2903_s10 = inlined_call_operand.vmem [shape: f32[1,128], index: 10, kind: input, shape index: {}]   ;;  %s2904_s11 = inlined_call_operand.hbm [shape: bf16[16,128], index: 11, kind: output, shape index: {}]  }
   0x1   :  { %17 = vsyncpa [#allocation6], 0 }
   0x2   :  { %18 = vsyncpa [#allocation9], 0 }
   0x3   :  { %19 = vsyncpa [#allocation12], 0 }
   0x4   :  { %20 = vsyncpa [#allocation4], 0  ;;  %s2665_s17 = smov [#allocation5]   ;;  %s2501_s21 = scalar_lea.hbm %s2894_s1, 30720 }
   0x5   :  { %s38_s18 = sshll.u32 %s2665_s17, 4  ;;  %p2502_p0 = scmp.ne.s32.totalorder %s2894_s1, %s2501_s21  ;;  %s39_s18 = int_to_ptr.vmem [resolvable:$true] %s38_s18 }
   0x6   :  { %p2505_p1 = scmp.lt.u32.totalorder %s2501_s21, %s2894_s1 }
   0x8   :  { %p2507_p2 = pnand %p2505_p1, %p2502_p0 }
   0xa   :  { %2510 = shalt.err (!%p2507_p2)
}
   0xb   :  { %s2511_s26 = scalar_lea.vmem %s39_s18, 30720  ;;  %p2516_p4 = scmp.lt.s32.totalorder %s39_s18, %s39_s18 }
   0xc   :  { %p2512_p3 = scmp.ne.s32.totalorder %s39_s18, %s2511_s26  ;;  %p2517_p5 = scmp.lt.s32.totalorder %s2511_s26, %s2511_s26 }
   0xe   :  { %p2518_p6 = por %p2517_p5, %p2516_p4 }
  0x10   :  { %p2519_p7 = pnand %p2518_p6, %p2512_p3 }
  0x12   :  { %2522 = shalt.err (!%p2519_p7)
}
  0x13   :  { %s2666_s27 = smov 768   ;;  %s2667_s28 = smov 48  }
  0x14   :  { %44 = dma.hbm_to_vmem [thread:$0]  %s2894_s1, 30720, %s39_s18, [#allocation6], %s2666_s27, %s2666_s27, %s2667_s28  }
  0x15   :  { %s2668_s12 = smov [#allocation8]   ;;  %s2523_s16 = scalar_lea.hbm %s2897_s4, 6144 }
  0x16   :  { %s62_s13 = sshll.u32 %s2668_s12, 4  ;;  %p2524_p8 = scmp.ne.s32.totalorder %s2897_s4, %s2523_s16  ;;  %s63_s13 = int_to_ptr.vmem [resolvable:$true] %s62_s13 }
  0x17   :  { %p2527_p9 = scmp.lt.u32.totalorder %s2523_s16, %s2897_s4 }
  0x19   :  { %p2529_p10 = pnand %p2527_p9, %p2524_p8 }
  0x1b   :  { %2532 = shalt.err (!%p2529_p10)
}
  0x1c   :  { %s2533_s22 = scalar_lea.vmem %s63_s13, 6144  ;;  %p2538_p12 = scmp.lt.s32.totalorder %s63_s13, %s63_s13 }
  0x1d   :  { %p2534_p11 = scmp.ne.s32.totalorder %s63_s13, %s2533_s22  ;;  %p2539_p13 = scmp.lt.s32.totalorder %s2533_s22, %s2533_s22 }
  0x1f   :  { %p2540_p0 = por %p2539_p13, %p2538_p12 }
  0x21   :  { %p2541_p1 = pnand %p2540_p0, %p2534_p11 }
  0x23   :  { %2544 = shalt.err (!%p2541_p1)
}
  0x24   :  { %s2669_s1 = smov 256   ;;  %s2670_s18 = smov 16  }
  0x25   :  { %68 = dma.hbm_to_vmem [thread:$0]  %s2897_s4, 6144, %s63_s13, [#allocation9], %s2669_s1, %s2669_s1, %s2670_s18  }
  0x26   :  { %s2671_s25 = smov [#allocation2]   ;;  %s2545_s29 = scalar_lea.hbm %s2893_s0, 1280 }
  0x27   :  { %s26_s26 = sshll.u32 %s2671_s25, 4  ;;  %p2546_p2 = scmp.ne.s32.totalorder %s2893_s0, %s2545_s29  ;;  %s27_s26 = int_to_ptr.vmem [resolvable:$true] %s26_s26 }
  0x28   :  { %p2549_p3 = scmp.lt.u32.totalorder %s2545_s29, %s2893_s0 }
  0x2a   :  { %p2551_p4 = pnand %p2549_p3, %p2546_p2 }
  0x2c   :  { %2554 = shalt.err (!%p2551_p4)
}
  0x2d   :  { %s2555_s16 = scalar_lea.vmem %s27_s26, 1280  ;;  %p2560_p6 = scmp.lt.s32.totalorder %s27_s26, %s27_s26 }
  0x2e   :  { %p2556_p5 = scmp.ne.s32.totalorder %s27_s26, %s2555_s16  ;;  %p2561_p7 = scmp.lt.s32.totalorder %s2555_s16, %s2555_s16 }
  0x30   :  { %p2562_p8 = por %p2561_p7, %p2560_p6 }
  0x32   :  { %p2563_p9 = pnand %p2562_p8, %p2556_p5 }
  0x34   :  { %2566 = shalt.err (!%p2563_p9)
}
  0x35   :  { %s2672_s4 = smov 640   ;;  %s2673_s13 = smov 40  }
  0x36   :  { %32 = dma.hbm_to_vmem [thread:$0]  %s2893_s0, 1280, %s27_s26, [#allocation3], %s2672_s4, %s2672_s4, %s2673_s13  }
  0x37   :  { %s2674_s20 = smov [#allocation7]   ;;  %s2675_s22 = smov [#allocation10]  }
  0x38   :  { %s53_s21 = sshll.u32 %s2674_s20, 4  ;;  %s78_s1 = sshll.u32 %s2675_s22, 4  ;;  %s54_s21 = int_to_ptr.vmem [resolvable:$true] %s53_s21  ;;  %s79_s1 = int_to_ptr.vmem [resolvable:$true] %s78_s1 }
  0x39   :  { %s2567_s24 = scalar_lea.hbm %s2896_s3, 96 }
  0x3a   :  { %p2568_p10 = scmp.ne.s32.totalorder %s2896_s3, %s2567_s24  ;;  %p2571_p11 = scmp.lt.u32.totalorder %s2567_s24, %s2896_s3 }
  0x3c   :  { %p2573_p12 = pnand %p2571_p11, %p2568_p10 }
  0x3e   :  { %2576 = shalt.err (!%p2573_p12)
}
  0x3f   :  { %s2577_s0 = scalar_lea.vmem %s54_s21, 96  ;;  %p2582_p0 = scmp.lt.s32.totalorder %s54_s21, %s54_s21 }
  0x40   :  { %p2578_p13 = scmp.ne.s32.totalorder %s54_s21, %s2577_s0  ;;  %p2583_p1 = scmp.lt.s32.totalorder %s2577_s0, %s2577_s0 }
  0x42   :  { %p2584_p2 = por %p2583_p1, %p2582_p0 }
  0x44   :  { %p2585_p3 = pnand %p2584_p2, %p2578_p13 }
  0x46   :  { %2588 = shalt.err (!%p2585_p3)
}
  0x47   :  { %56 = dma.hbm_to_vmem [thread:$0]  %s2896_s3, 96, %s54_s21, [#allocation6]  }
  0x48   :  { %s2589_s15 = scalar_lea.hbm %s2900_s7, 2048 }
  0x49   :  { %p2590_p4 = scmp.ne.s32.totalorder %s2900_s7, %s2589_s15  ;;  %p2593_p5 = scmp.lt.u32.totalorder %s2589_s15, %s2900_s7 }
  0x4b   :  { %p2595_p6 = pnand %p2593_p5, %p2590_p4 }
  0x4d   :  { %2598 = shalt.err (!%p2595_p6)
}
  0x4e   :  { %s2599_s19 = scalar_lea.vmem %s79_s1, 2048  ;;  %p2604_p8 = scmp.lt.s32.totalorder %s79_s1, %s79_s1 }
  0x4f   :  { %p2600_p7 = scmp.ne.s32.totalorder %s79_s1, %s2599_s19  ;;  %p2605_p9 = scmp.lt.s32.totalorder %s2599_s19, %s2599_s19 }
  0x51   :  { %p2606_p10 = por %p2605_p9, %p2604_p8 }
  0x53   :  { %p2607_p11 = pnand %p2606_p10, %p2600_p7 }
  0x55   :  { %2610 = shalt.err (!%p2607_p11)
}
  0x56   :  { %s2676_s3 = smov 64   ;;  %s2677_s20 = smov 4  }
  0x57   :  { %84 = dma.hbm_to_vmem [thread:$0]  %s2900_s7, 2048, %s79_s1, [#allocation9], %s2676_s3, %s2676_s3, %s2677_s20  }
  0x58   :  { %s2678_s18 = smov [#allocation11]   ;;  %s2611_s27 = scalar_lea.hbm %s2902_s9, 1024 }
  0x59   :  { %s92_s23 = sshll.u32 %s2678_s18, 4  ;;  %p2612_p12 = scmp.ne.s32.totalorder %s2902_s9, %s2611_s27  ;;  %s93_s23 = int_to_ptr.vmem [resolvable:$true] %s92_s23 }
  0x5a   :  { %p2615_p13 = scmp.lt.u32.totalorder %s2611_s27, %s2902_s9 }
  0x5c   :  { %p2617_p0 = pnand %p2615_p13, %p2612_p12 }
  0x5e   :  { %2620 = shalt.err (!%p2617_p0)
}
  0x5f   :  { %s2621_s30 = scalar_lea.vmem %s93_s23, 1024  ;;  %p2626_p2 = scmp.lt.s32.totalorder %s93_s23, %s93_s23 }
  0x60   :  { %p2622_p1 = scmp.ne.s32.totalorder %s93_s23, %s2621_s30  ;;  %p2627_p3 = scmp.lt.s32.totalorder %s2621_s30, %s2621_s30 }
  0x62   :  { %p2628_p4 = por %p2627_p3, %p2626_p2 }
  0x64   :  { %p2629_p5 = pnand %p2628_p4, %p2622_p1 }
  0x66   :  { %2632 = shalt.err (!%p2629_p5)
}
  0x67   :  { %98 = dma.hbm_to_vmem [thread:$0]  %s2902_s9, 1024, %s93_s23, [#allocation12], %s2676_s3, %s2676_s3, %s2677_s20  }
  0x68   :  { %2655 = dma.done.wait [#allocation3], 1280  }
  0x69   :  { %2656 = vsyncadd [#allocation3], 4294966016 }
  0x6a   :  { %2657 = dma.done.wait [#allocation6], 30816  }
  0x6b   :  { %2658 = vsyncadd [#allocation6], 4294936480 }
  0x6c   :  { %2659 = dma.done.wait [#allocation9], 8192  }
  0x6d   :  { %2660 = vsyncadd [#allocation9], 4294959104 }
  0x6e   :  { %2661 = dma.done.wait [#allocation12], 1024  }
  0x6f   :  { %2662 = vsyncadd [#allocation12], 4294966272  ;;  %v131_v0 = vld [vmem:[#allocation5 + $0x8] sm:$0xff]  ;;  %v133_v1 = vld [vmem:[#allocation5 + $0x18] sm:$0xff]  ;;  %vm2680_vm0 = vmmov 0   ;;  %s2681_s17 = smov [#allocation13]  }
  0x70   :  { %v130_v2 = vld [vmem:[#allocation5] sm:$0xff]  ;;  %v371_v3 = vunpack.c.l.s8.bf16 %v131_v0  ;;  %v377_v4 = vunpack.c.h.s8.bf16 %v131_v0  ;;  %v373_v5 = vunpack.c.l.s8.bf16 %v133_v1  ;;  %v379_v6 = vunpack.c.h.s8.bf16 %v133_v1  ;;  %v132_v7 = vld [vmem:[#allocation5 + $0x10] sm:$0xff]  ;;  %v137_v10 = vld [vmem:[#allocation5 + $0x38] sm:$0xff] }
  0x71   :  { %v370_v8 = vunpack.c.l.s8.bf16 %v130_v2  ;;  %v372_v9 = vunpack.c.l.s8.bf16 %v132_v7  ;;  %v139_v11 = vld [vmem:[#allocation5 + $0x48] sm:$0xff]  ;;  %v376_v12 = vunpack.c.h.s8.bf16 %v130_v2  ;;  %v378_v13 = vunpack.c.h.s8.bf16 %v132_v7  ;;  %v136_v16 = vld [vmem:[#allocation5 + $0x30] sm:$0xff]  ;;  %v138_v17 = vld [vmem:[#allocation5 + $0x40] sm:$0xff] }
  0x72   :  { %900 = vmatprep.subr.bf16.mxu0 %v371_v3  ;;  %1115 = vmatprep.subr.bf16.mxu1 %v373_v5  ;;  %v383_v14 = vunpack.c.l.s8.bf16 %v137_v10  ;;  %v385_v15 = vunpack.c.l.s8.bf16 %v139_v11  ;;  %v382_v18 = vunpack.c.l.s8.bf16 %v136_v16  ;;  %v384_v19 = vunpack.c.l.s8.bf16 %v138_v17  ;;  %v143_v22 = vld [vmem:[#allocation5 + $0x68] sm:$0xff]  ;;  %v145_v23 = vld [vmem:[#allocation5 + $0x78] sm:$0xff]  ;;  %v142_v29 = vld [vmem:[#allocation5 + $0x60] sm:$0xff] }
  0x73   :  { %901 = vmatpush1.bf16.msra.mxu0 %v370_v8  ;;  %1116 = vmatpush1.bf16.msra.mxu1 %v372_v9  ;;  %v389_v20 = vunpack.c.h.s8.bf16 %v137_v10  ;;  %v391_v21 = vunpack.c.h.s8.bf16 %v139_v11  ;;  %v2452_v24 = vld [vmem:[#allocation2 + $0x4] ss:$40 sps:$4 sm:$0xff]   ;;  %v388_v25 = vunpack.c.h.s8.bf16 %v136_v16  ;;  %v390_v26 = vunpack.c.h.s8.bf16 %v138_v17  ;;  %v151_v36 = vld [vmem:[#allocation5 + $0xa8] sm:$0xff]  ;;  %v150_v42 = vld [vmem:[#allocation5 + $0xa0] sm:$0xff] }
  0x74   :  { %902 = vmatprep.subr.bf16.mxu0 %v377_v4  ;;  %1117 = vmatprep.subr.bf16.mxu1 %v379_v6  ;;  %v395_v27 = vunpack.c.l.s8.bf16 %v143_v22  ;;  %v397_v28 = vunpack.c.l.s8.bf16 %v145_v23  ;;  %v144_v30 = vld [vmem:[#allocation5 + $0x70] sm:$0xff]  ;;  %v394_v31 = vunpack.c.l.s8.bf16 %v142_v29  ;;  %v401_v33 = vunpack.c.h.s8.bf16 %v143_v22  ;;  %v149_v35 = vld [vmem:[#allocation5 + $0x98] sm:$0xff]  ;;  %v155_v47 = vld [vmem:[#allocation5 + $0xc8] sm:$0xff] }
  0x75   :  { %932 = vmatprep.mubr.bf16.mxu0 %v2452_v24  ;;  %1147 = vmatprep.mubr.bf16.mxu1 %v2452_v24  ;;  %v396_v32 = vunpack.c.l.s8.bf16 %v144_v30  ;;  %v403_v34 = vunpack.c.h.s8.bf16 %v145_v23  ;;  %v400_v37 = vunpack.c.h.s8.bf16 %v142_v29  ;;  %v402_v38 = vunpack.c.h.s8.bf16 %v144_v30  ;;  %v148_v41 = vld [vmem:[#allocation5 + $0x90] sm:$0xff]  ;;  %v157_v48 = vld [vmem:[#allocation5 + $0xd8] sm:$0xff]  ;;  %v154_v51 = vld [vmem:[#allocation5 + $0xc0] sm:$0xff] }
  0x76   :  { %v407_v39 = vunpack.c.l.s8.bf16 %v149_v35  ;;  %v409_v40 = vunpack.c.l.s8.bf16 %v151_v36  ;;  %v406_v43 = vunpack.c.l.s8.bf16 %v148_v41  ;;  %v408_v44 = vunpack.c.l.s8.bf16 %v150_v42  ;;  %v156_v54 = vld [vmem:[#allocation5 + $0xd0] sm:$0xff]  ;;  %v161_v59 = vld [vmem:[#allocation5 + $0xf8] sm:$0xff]  ;;  %v163_v60 = vld [vmem:[#allocation5 + $0x108] sm:$0xff] }
  0x77   :  { %903 = vmatpush1.bf16.msra.mxu0 %v376_v12  ;;  %1118 = vmatpush1.bf16.msra.mxu1 %v378_v13  ;;  %v413_v45 = vunpack.c.h.s8.bf16 %v149_v35  ;;  %v415_v46 = vunpack.c.h.s8.bf16 %v151_v36  ;;  %v412_v49 = vunpack.c.h.s8.bf16 %v148_v41  ;;  %v414_v50 = vunpack.c.h.s8.bf16 %v150_v42  ;;  %v160_v61 = vld [vmem:[#allocation5 + $0xf0] sm:$0xff]  ;;  %v162_v62 = vld [vmem:[#allocation5 + $0x100] sm:$0xff]  ;;  %v167_v7 = vld [vmem:[#allocation5 + $0x128] sm:$0xff] }
  0x78   :  { %904 = vmatprep.subr.bf16.mxu0 %v383_v14  ;;  %1119 = vmatprep.subr.bf16.mxu1 %v385_v15  ;;  %v419_v52 = vunpack.c.l.s8.bf16 %v155_v47  ;;  %v421_v53 = vunpack.c.l.s8.bf16 %v157_v48  ;;  %v418_v55 = vunpack.c.l.s8.bf16 %v154_v51  ;;  %v420_v56 = vunpack.c.l.s8.bf16 %v156_v54  ;;  %v169_v8 = vld [vmem:[#allocation5 + $0x138] sm:$0xff]  ;;  %v166_v9 = vld [vmem:[#allocation5 + $0x120] sm:$0xff]  ;;  %v168_v10 = vld [vmem:[#allocation5 + $0x130] sm:$0xff] }
  0x79   :  { %v425_v57 = vunpack.c.h.s8.bf16 %v155_v47  ;;  %v427_v58 = vunpack.c.h.s8.bf16 %v157_v48  ;;  %v424_v63 = vunpack.c.h.s8.bf16 %v154_v51  ;;  %v426_v0 = vunpack.c.h.s8.bf16 %v156_v54  ;;  %v184_v51 = vld [vmem:[#allocation5 + $0x1b0] sm:$0xff] }
  0x7a   :  { %v431_v1 = vunpack.c.l.s8.bf16 %v161_v59  ;;  %v433_v2 = vunpack.c.l.s8.bf16 %v163_v60  ;;  %v430_v3 = vunpack.c.l.s8.bf16 %v160_v61  ;;  %v432_v4 = vunpack.c.l.s8.bf16 %v162_v62 }
  0x7b   :  { %905 = vmatpush1.bf16.msra.mxu0 %v382_v18  ;;  %1120 = vmatpush1.bf16.msra.mxu1 %v384_v19  ;;  %v437_v5 = vunpack.c.h.s8.bf16 %v161_v59  ;;  %v439_v6 = vunpack.c.h.s8.bf16 %v163_v60  ;;  %v436_v11 = vunpack.c.h.s8.bf16 %v160_v61  ;;  %v438_v12 = vunpack.c.h.s8.bf16 %v162_v62  ;;  %v173_v19 = vld [vmem:[#allocation5 + $0x158] sm:$0xff] }
  0x7c   :  { %906 = vmatprep.subr.bf16.mxu0 %v389_v20  ;;  %1121 = vmatprep.subr.bf16.mxu1 %v391_v21  ;;  %v443_v13 = vunpack.c.l.s8.bf16 %v167_v7  ;;  %v445_v14 = vunpack.c.l.s8.bf16 %v169_v8  ;;  %v442_v15 = vunpack.c.l.s8.bf16 %v166_v9  ;;  %v444_v16 = vunpack.c.l.s8.bf16 %v168_v10  ;;  %v175_v20 = vld [vmem:[#allocation5 + $0x168] sm:$0xff] }
  0x7d   :  { %v449_v17 = vunpack.c.h.s8.bf16 %v167_v7  ;;  %v451_v18 = vunpack.c.h.s8.bf16 %v169_v8  ;;  %v448_v21 = vunpack.c.h.s8.bf16 %v166_v9  ;;  %v450_v22 = vunpack.c.h.s8.bf16 %v168_v10 }
  0x7e   :  { %v455_v23 = vunpack.c.l.s8.bf16 %v173_v19  ;;  %v457_v24 = vunpack.c.l.s8.bf16 %v175_v20  ;;  %v461_v29 = vunpack.c.h.s8.bf16 %v173_v19  ;;  %v463_v30 = vunpack.c.h.s8.bf16 %v175_v20 }
  0x7f   :  { %907 = vmatpush1.bf16.msra.mxu0 %v388_v25  ;;  %1122 = vmatpush1.bf16.msra.mxu1 %v390_v26  ;;  %v172_v25 = vld [vmem:[#allocation5 + $0x150] sm:$0xff]  ;;  %v174_v26 = vld [vmem:[#allocation5 + $0x160] sm:$0xff]  ;;  %v484_v59 = vunpack.c.h.s8.bf16 %v184_v51 }
  0x80   :  { %908 = vmatprep.subr.bf16.mxu0 %v395_v27  ;;  %1123 = vmatprep.subr.bf16.mxu1 %v397_v28  ;;  %v454_v27 = vunpack.c.l.s8.bf16 %v172_v25  ;;  %v456_v28 = vunpack.c.l.s8.bf16 %v174_v26 }
  0x83   :  { %909 = vmatpush1.bf16.msra.mxu0 %v394_v31  ;;  %1124 = vmatpush1.bf16.msra.mxu1 %v396_v32  ;;  %v179_v31 = vld [vmem:[#allocation5 + $0x188] sm:$0xff]  ;;  %v181_v32 = vld [vmem:[#allocation5 + $0x198] sm:$0xff] }
  0x84   :  { %910 = vmatprep.subr.bf16.mxu0 %v401_v33  ;;  %1125 = vmatprep.subr.bf16.mxu1 %v403_v34  ;;  %v460_v33 = vunpack.c.h.s8.bf16 %v172_v25  ;;  %v462_v34 = vunpack.c.h.s8.bf16 %v174_v26  ;;  %v467_v35 = vunpack.c.l.s8.bf16 %v179_v31  ;;  %v469_v36 = vunpack.c.l.s8.bf16 %v181_v32 }
  0x85   :  { %v473_v42 = vunpack.c.h.s8.bf16 %v179_v31 }
  0x87   :  { %911 = vmatpush1.bf16.msra.mxu0 %v400_v37  ;;  %1126 = vmatpush1.bf16.msra.mxu1 %v402_v38  ;;  %v178_v37 = vld [vmem:[#allocation5 + $0x180] sm:$0xff]  ;;  %v180_v38 = vld [vmem:[#allocation5 + $0x190] sm:$0xff] }
  0x88   :  { %912 = vmatprep.subr.bf16.mxu0 %v407_v39  ;;  %1127 = vmatprep.subr.bf16.mxu1 %v409_v40  ;;  %v2454_v39 = vld [vmem:[#allocation2] ss:$40 sps:$4 sm:$0xff]   ;;  %v466_v40 = vunpack.c.l.s8.bf16 %v178_v37  ;;  %v468_v41 = vunpack.c.l.s8.bf16 %v180_v38  ;;  %v472_v47 = vunpack.c.h.s8.bf16 %v178_v37  ;;  %v474_v48 = vunpack.c.h.s8.bf16 %v180_v38 }
  0x8b   :  { %913 = vmatpush1.bf16.msra.mxu0 %v406_v43  ;;  %1128 = vmatpush1.bf16.msra.mxu1 %v408_v44  ;;  %v475_v43 = vunpack.c.h.s8.bf16 %v181_v32  ;;  %v185_v44 = vld [vmem:[#allocation5 + $0x1b8] sm:$0xff] }
  0x8c   :  { %914 = vmatprep.subr.bf16.mxu0 %v413_v45  ;;  %1129 = vmatprep.subr.bf16.mxu1 %v415_v46  ;;  %v187_v45 = vld [vmem:[#allocation5 + $0x1c8] sm:$0xff]  ;;  %v2457_v46 = vld [vmem:[#allocation2 + $0xc] ss:$40 sps:$4 sm:$0xff]  }
  0x8f   :  { %915 = vmatpush1.bf16.msra.mxu0 %v412_v49  ;;  %1130 = vmatpush1.bf16.msra.mxu1 %v414_v50  ;;  %v479_v49 = vunpack.c.l.s8.bf16 %v185_v44  ;;  %v481_v50 = vunpack.c.l.s8.bf16 %v187_v45 }
  0x90   :  { %916 = vmatprep.subr.bf16.mxu0 %v419_v52  ;;  %1131 = vmatprep.subr.bf16.mxu1 %v421_v53  ;;  %v186_v52 = vld [vmem:[#allocation5 + $0x1c0] sm:$0xff]  ;;  %v478_v53 = vunpack.c.l.s8.bf16 %v184_v51 }
  0x91   :  { %v480_v54 = vunpack.c.l.s8.bf16 %v186_v52  ;;  %v486_v60 = vunpack.c.h.s8.bf16 %v186_v52 }
  0x93   :  { %917 = vmatpush1.bf16.msra.mxu0 %v418_v55  ;;  %1132 = vmatpush1.bf16.msra.mxu1 %v420_v56  ;;  %v485_v55 = vunpack.c.h.s8.bf16 %v185_v44  ;;  %v487_v56 = vunpack.c.h.s8.bf16 %v187_v45 }
  0x94   :  { %918 = vmatprep.subr.bf16.mxu0 %v425_v57  ;;  %1133 = vmatprep.subr.bf16.mxu1 %v427_v58  ;;  %v191_v57 = vld [vmem:[#allocation5 + $0x1e8] sm:$0xff]  ;;  %v193_v58 = vld [vmem:[#allocation5 + $0x1f8] sm:$0xff] }
  0x95   :  { %v491_v61 = vunpack.c.l.s8.bf16 %v191_v57  ;;  %v493_v62 = vunpack.c.l.s8.bf16 %v193_v58 }
  0x97   :  { %919 = vmatpush1.bf16.msra.mxu0 %v424_v63  ;;  %1134 = vmatpush1.bf16.msra.mxu1 %v426_v0  ;;  %v190_v63 = vld [vmem:[#allocation5 + $0x1e0] sm:$0xff]  ;;  %v192_v0 = vld [vmem:[#allocation5 + $0x1f0] sm:$0xff] }
  0x98   :  { %920 = vmatprep.subr.bf16.mxu0 %v431_v1  ;;  %1135 = vmatprep.subr.bf16.mxu1 %v433_v2  ;;  %v490_v1 = vunpack.c.l.s8.bf16 %v190_v63  ;;  %v492_v2 = vunpack.c.l.s8.bf16 %v192_v0  ;;  %v496_v7 = vunpack.c.h.s8.bf16 %v190_v63  ;;  %v498_v8 = vunpack.c.h.s8.bf16 %v192_v0 }
  0x9b   :  { %921 = vmatpush1.bf16.msra.mxu0 %v430_v3  ;;  %1136 = vmatpush1.bf16.msra.mxu1 %v432_v4  ;;  %v497_v3 = vunpack.c.h.s8.bf16 %v191_v57  ;;  %v499_v4 = vunpack.c.h.s8.bf16 %v193_v58 }
  0x9c   :  { %922 = vmatprep.subr.bf16.mxu0 %v437_v5  ;;  %1137 = vmatprep.subr.bf16.mxu1 %v439_v6  ;;  %v197_v5 = vld [vmem:[#allocation5 + $0x218] sm:$0xff]  ;;  %v199_v6 = vld [vmem:[#allocation5 + $0x228] sm:$0xff] }
  0x9d   :  { %v503_v9 = vunpack.c.l.s8.bf16 %v197_v5  ;;  %v505_v10 = vunpack.c.l.s8.bf16 %v199_v6 }
  0x9f   :  { %923 = vmatpush1.bf16.msra.mxu0 %v436_v11  ;;  %1138 = vmatpush1.bf16.msra.mxu1 %v438_v12  ;;  %v196_v11 = vld [vmem:[#allocation5 + $0x210] sm:$0xff]  ;;  %v198_v12 = vld [vmem:[#allocation5 + $0x220] sm:$0xff] }
  0xa0   :  { %924 = vmatprep.subr.bf16.mxu0 %v443_v13  ;;  %1139 = vmatprep.subr.bf16.mxu1 %v445_v14  ;;  %v502_v13 = vunpack.c.l.s8.bf16 %v196_v11  ;;  %v504_v14 = vunpack.c.l.s8.bf16 %v198_v12  ;;  %v508_v19 = vunpack.c.h.s8.bf16 %v196_v11  ;;  %v510_v20 = vunpack.c.h.s8.bf16 %v198_v12 }
  0xa3   :  { %925 = vmatpush1.bf16.msra.mxu0 %v442_v15  ;;  %1140 = vmatpush1.bf16.msra.mxu1 %v444_v16  ;;  %v509_v15 = vunpack.c.h.s8.bf16 %v197_v5  ;;  %v511_v16 = vunpack.c.h.s8.bf16 %v199_v6 }
  0xa4   :  { %926 = vmatprep.subr.bf16.mxu0 %v449_v17  ;;  %1141 = vmatprep.subr.bf16.mxu1 %v451_v18  ;;  %v203_v17 = vld [vmem:[#allocation5 + $0x248] sm:$0xff]  ;;  %v205_v18 = vld [vmem:[#allocation5 + $0x258] sm:$0xff] }
  0xa7   :  { %927 = vmatpush1.bf16.msra.mxu0 %v448_v21  ;;  %1142 = vmatpush1.bf16.msra.mxu1 %v450_v22  ;;  %v515_v21 = vunpack.c.l.s8.bf16 %v203_v17  ;;  %v517_v22 = vunpack.c.l.s8.bf16 %v205_v18 }
  0xa8   :  { %928 = vmatprep.subr.bf16.mxu0 %v455_v23  ;;  %1143 = vmatprep.subr.bf16.mxu1 %v457_v24  ;;  %v202_v23 = vld [vmem:[#allocation5 + $0x240] sm:$0xff]  ;;  %v204_v24 = vld [vmem:[#allocation5 + $0x250] sm:$0xff] }
  0xa9   :  { %v514_v25 = vunpack.c.l.s8.bf16 %v202_v23  ;;  %v516_v26 = vunpack.c.l.s8.bf16 %v204_v24  ;;  %v520_v31 = vunpack.c.h.s8.bf16 %v202_v23  ;;  %v522_v32 = vunpack.c.h.s8.bf16 %v204_v24 }
  0xab   :  { %929 = vmatpush1.bf16.msra.mxu0 %v454_v27  ;;  %1144 = vmatpush1.bf16.msra.mxu1 %v456_v28  ;;  %v521_v27 = vunpack.c.h.s8.bf16 %v203_v17  ;;  %v523_v28 = vunpack.c.h.s8.bf16 %v205_v18 }
  0xac   :  { %930 = vmatprep.subr.bf16.mxu0 %v461_v29  ;;  %1145 = vmatprep.subr.bf16.mxu1 %v463_v30  ;;  %v209_v29 = vld [vmem:[#allocation5 + $0x278] sm:$0xff]  ;;  %v211_v30 = vld [vmem:[#allocation5 + $0x288] sm:$0xff] }
  0xaf   :  { %931 = vmatpush1.bf16.msra.mxu0 %v460_v33  ;;  %1146 = vmatpush1.bf16.msra.mxu1 %v462_v34  ;;  %v527_v33 = vunpack.c.l.s8.bf16 %v209_v29  ;;  %v529_v34 = vunpack.c.l.s8.bf16 %v211_v30 }
  0xb0   :  { %943 = vmatprep.subr.bf16.mxu0 %v467_v35  ;;  %1158 = vmatprep.subr.bf16.mxu1 %v469_v36  ;;  %v208_v35 = vld [vmem:[#allocation5 + $0x270] sm:$0xff]  ;;  %v210_v36 = vld [vmem:[#allocation5 + $0x280] sm:$0xff] }
  0xb1   :  { %v526_v37 = vunpack.c.l.s8.bf16 %v208_v35  ;;  %v528_v38 = vunpack.c.l.s8.bf16 %v210_v36  ;;  %v534_v44 = vunpack.c.h.s8.bf16 %v210_v36 }
  0xb2   :  { %933 = vmatmul.mubr.bf16.vlgmr.msra.gmra.mrb[0].mxu0 %v2454_v39  ;;  %1148 = vmatmul.mubr.bf16.vlgmr.msra.gmra.mrb[0].mxu1 %v2454_v39  ;;  %v533_v39 = vunpack.c.h.s8.bf16 %v209_v29 }
  0xb3   :  { %944 = vmatpush1.bf16.msra.mxu0 %v466_v40  ;;  %1159 = vmatpush1.bf16.msra.mxu1 %v468_v41  ;;  %v535_v40 = vunpack.c.h.s8.bf16 %v211_v30  ;;  %v215_v41 = vld [vmem:[#allocation5 + $0x2a8] sm:$0xff] }
  0xb4   :  { %945 = vmatprep.subr.bf16.mxu0 %v473_v42  ;;  %1160 = vmatprep.subr.bf16.mxu1 %v475_v43  ;;  %v217_v42 = vld [vmem:[#allocation5 + $0x2b8] sm:$0xff]  ;;  %v532_v43 = vunpack.c.h.s8.bf16 %v208_v35  ;;  %v539_v45 = vunpack.c.l.s8.bf16 %v215_v41  ;;  %v545_v51 = vunpack.c.h.s8.bf16 %v215_v41 }
  0xb5   :  { %975 = vmatprep.mubr.bf16.mxu0 %v2457_v46  ;;  %1190 = vmatprep.mubr.bf16.mxu1 %v2457_v46  ;;  %v541_v46 = vunpack.c.l.s8.bf16 %v217_v42  ;;  %v547_v52 = vunpack.c.h.s8.bf16 %v217_v42 }
  0xb7   :  { %946 = vmatpush1.bf16.msra.mxu0 %v472_v47  ;;  %1161 = vmatpush1.bf16.msra.mxu1 %v474_v48  ;;  %v214_v47 = vld [vmem:[#allocation5 + $0x2a0] sm:$0xff]  ;;  %v216_v48 = vld [vmem:[#allocation5 + $0x2b0] sm:$0xff] }
  0xb8   :  { %947 = vmatprep.subr.bf16.mxu0 %v479_v49  ;;  %1162 = vmatprep.subr.bf16.mxu1 %v481_v50  ;;  %v538_v49 = vunpack.c.l.s8.bf16 %v214_v47  ;;  %v540_v50 = vunpack.c.l.s8.bf16 %v216_v48 }
  0xbb   :  { %948 = vmatpush1.bf16.msra.mxu0 %v478_v53  ;;  %1163 = vmatpush1.bf16.msra.mxu1 %v480_v54  ;;  %v221_v53 = vld [vmem:[#allocation5 + $0x2d8] sm:$0xff]  ;;  %v223_v54 = vld [vmem:[#allocation5 + $0x2e8] sm:$0xff] }
  0xbc   :  { %949 = vmatprep.subr.bf16.mxu0 %v485_v55  ;;  %1164 = vmatprep.subr.bf16.mxu1 %v487_v56  ;;  %v544_v55 = vunpack.c.h.s8.bf16 %v214_v47  ;;  %v546_v56 = vunpack.c.h.s8.bf16 %v216_v48  ;;  %v551_v57 = vunpack.c.l.s8.bf16 %v221_v53  ;;  %v553_v58 = vunpack.c.l.s8.bf16 %v223_v54 }
  0xbd   :  { %v557_v63 = vunpack.c.h.s8.bf16 %v221_v53  ;;  %v559_v0 = vunpack.c.h.s8.bf16 %v223_v54 }
  0xbf   :  { %950 = vmatpush1.bf16.msra.mxu0 %v484_v59  ;;  %1165 = vmatpush1.bf16.msra.mxu1 %v486_v60  ;;  %v220_v59 = vld [vmem:[#allocation5 + $0x2d0] sm:$0xff]  ;;  %v222_v60 = vld [vmem:[#allocation5 + $0x2e0] sm:$0xff] }
  0xc0   :  { %951 = vmatprep.subr.bf16.mxu0 %v491_v61  ;;  %1166 = vmatprep.subr.bf16.mxu1 %v493_v62  ;;  %v550_v61 = vunpack.c.l.s8.bf16 %v220_v59  ;;  %v552_v62 = vunpack.c.l.s8.bf16 %v222_v60 }
  0xc3   :  { %952 = vmatpush1.bf16.msra.mxu0 %v490_v1  ;;  %1167 = vmatpush1.bf16.msra.mxu1 %v492_v2  ;;  %v227_v1 = vld [vmem:[#allocation5 + $0x308] sm:$0xff]  ;;  %v229_v2 = vld [vmem:[#allocation5 + $0x318] sm:$0xff] }
  0xc4   :  { %953 = vmatprep.subr.bf16.mxu0 %v497_v3  ;;  %1168 = vmatprep.subr.bf16.mxu1 %v499_v4  ;;  %v556_v3 = vunpack.c.h.s8.bf16 %v220_v59  ;;  %v558_v4 = vunpack.c.h.s8.bf16 %v222_v60  ;;  %v563_v5 = vunpack.c.l.s8.bf16 %v227_v1  ;;  %v565_v6 = vunpack.c.l.s8.bf16 %v229_v2 }
  0xc5   :  { %v569_v12 = vunpack.c.h.s8.bf16 %v227_v1 }
  0xc7   :  { %954 = vmatpush1.bf16.msra.mxu0 %v496_v7  ;;  %1169 = vmatpush1.bf16.msra.mxu1 %v498_v8  ;;  %v226_v7 = vld [vmem:[#allocation5 + $0x300] sm:$0xff]  ;;  %v228_v8 = vld [vmem:[#allocation5 + $0x310] sm:$0xff] }
  0xc8   :  { %955 = vmatprep.subr.bf16.mxu0 %v503_v9  ;;  %1170 = vmatprep.subr.bf16.mxu1 %v505_v10  ;;  %v2455_v9 = vld [vmem:[#allocation2 + $0x8] ss:$40 sps:$4 sm:$0xff]   ;;  %v562_v10 = vunpack.c.l.s8.bf16 %v226_v7  ;;  %v564_v11 = vunpack.c.l.s8.bf16 %v228_v8  ;;  %v568_v17 = vunpack.c.h.s8.bf16 %v226_v7  ;;  %v570_v18 = vunpack.c.h.s8.bf16 %v228_v8 }
  0xcb   :  { %956 = vmatpush1.bf16.msra.mxu0 %v502_v13  ;;  %1171 = vmatpush1.bf16.msra.mxu1 %v504_v14  ;;  %v571_v13 = vunpack.c.h.s8.bf16 %v229_v2  ;;  %v233_v14 = vld [vmem:[#allocation5 + $0x338] sm:$0xff] }
  0xcc   :  { %957 = vmatprep.subr.bf16.mxu0 %v509_v15  ;;  %1172 = vmatprep.subr.bf16.mxu1 %v511_v16  ;;  %v235_v15 = vld [vmem:[#allocation5 + $0x348] sm:$0xff] }
  0xcd   :  { %v2460_v16 = vld [vmem:[#allocation2 + $0x14] ss:$40 sps:$4 sm:$0xff]  }
  0xcf   :  { %958 = vmatpush1.bf16.msra.mxu0 %v508_v19  ;;  %1173 = vmatpush1.bf16.msra.mxu1 %v510_v20  ;;  %v575_v19 = vunpack.c.l.s8.bf16 %v233_v14  ;;  %v577_v20 = vunpack.c.l.s8.bf16 %v235_v15 }
  0xd0   :  { %959 = vmatprep.subr.bf16.mxu0 %v515_v21  ;;  %1174 = vmatprep.subr.bf16.mxu1 %v517_v22  ;;  %v232_v21 = vld [vmem:[#allocation5 + $0x330] sm:$0xff]  ;;  %v234_v22 = vld [vmem:[#allocation5 + $0x340] sm:$0xff] }
  0xd1   :  { %v574_v23 = vunpack.c.l.s8.bf16 %v232_v21  ;;  %v576_v24 = vunpack.c.l.s8.bf16 %v234_v22  ;;  %v580_v29 = vunpack.c.h.s8.bf16 %v232_v21  ;;  %v582_v30 = vunpack.c.h.s8.bf16 %v234_v22 }
  0xd3   :  { %960 = vmatpush1.bf16.msra.mxu0 %v514_v25  ;;  %1175 = vmatpush1.bf16.msra.mxu1 %v516_v26  ;;  %v581_v25 = vunpack.c.h.s8.bf16 %v233_v14  ;;  %v583_v26 = vunpack.c.h.s8.bf16 %v235_v15 }
  0xd4   :  { %961 = vmatprep.subr.bf16.mxu0 %v521_v27  ;;  %1176 = vmatprep.subr.bf16.mxu1 %v523_v28  ;;  %v239_v27 = vld [vmem:[#allocation5 + $0x368] sm:$0xff]  ;;  %v241_v28 = vld [vmem:[#allocation5 + $0x378] sm:$0xff] }
  0xd7   :  { %962 = vmatpush1.bf16.msra.mxu0 %v520_v31  ;;  %1177 = vmatpush1.bf16.msra.mxu1 %v522_v32  ;;  %v587_v31 = vunpack.c.l.s8.bf16 %v239_v27  ;;  %v589_v32 = vunpack.c.l.s8.bf16 %v241_v28 }
  0xd8   :  { %963 = vmatprep.subr.bf16.mxu0 %v527_v33  ;;  %1178 = vmatprep.subr.bf16.mxu1 %v529_v34  ;;  %v238_v33 = vld [vmem:[#allocation5 + $0x360] sm:$0xff]  ;;  %v240_v34 = vld [vmem:[#allocation5 + $0x370] sm:$0xff] }
  0xd9   :  { %v586_v35 = vunpack.c.l.s8.bf16 %v238_v33  ;;  %v588_v36 = vunpack.c.l.s8.bf16 %v240_v34  ;;  %v592_v41 = vunpack.c.h.s8.bf16 %v238_v33  ;;  %v594_v42 = vunpack.c.h.s8.bf16 %v240_v34 }
  0xdb   :  { %964 = vmatpush1.bf16.msra.mxu0 %v526_v37  ;;  %1179 = vmatpush1.bf16.msra.mxu1 %v528_v38  ;;  %v593_v37 = vunpack.c.h.s8.bf16 %v239_v27  ;;  %v595_v38 = vunpack.c.h.s8.bf16 %v241_v28 }
  0xdc   :  { %965 = vmatprep.subr.bf16.mxu0 %v533_v39  ;;  %1180 = vmatprep.subr.bf16.mxu1 %v535_v40  ;;  %v245_v39 = vld [vmem:[#allocation5 + $0x398] sm:$0xff]  ;;  %v247_v40 = vld [vmem:[#allocation5 + $0x3a8] sm:$0xff] }
  0xdf   :  { %966 = vmatpush1.bf16.msra.mxu0 %v532_v43  ;;  %1181 = vmatpush1.bf16.msra.mxu1 %v534_v44  ;;  %v599_v43 = vunpack.c.l.s8.bf16 %v245_v39  ;;  %v601_v44 = vunpack.c.l.s8.bf16 %v247_v40 }
  0xe0   :  { %967 = vmatprep.subr.bf16.mxu0 %v539_v45  ;;  %1182 = vmatprep.subr.bf16.mxu1 %v541_v46  ;;  %v244_v45 = vld [vmem:[#allocation5 + $0x390] sm:$0xff]  ;;  %v246_v46 = vld [vmem:[#allocation5 + $0x3a0] sm:$0xff] }
  0xe1   :  { %v598_v47 = vunpack.c.l.s8.bf16 %v244_v45  ;;  %v600_v48 = vunpack.c.l.s8.bf16 %v246_v46  ;;  %v604_v53 = vunpack.c.h.s8.bf16 %v244_v45  ;;  %v606_v54 = vunpack.c.h.s8.bf16 %v246_v46 }
  0xe3   :  { %968 = vmatpush1.bf16.msra.mxu0 %v538_v49  ;;  %1183 = vmatpush1.bf16.msra.mxu1 %v540_v50  ;;  %v605_v49 = vunpack.c.h.s8.bf16 %v245_v39  ;;  %v607_v50 = vunpack.c.h.s8.bf16 %v247_v40 }
  0xe4   :  { %969 = vmatprep.subr.bf16.mxu0 %v545_v51  ;;  %1184 = vmatprep.subr.bf16.mxu1 %v547_v52  ;;  %v251_v51 = vld [vmem:[#allocation5 + $0x3c8] sm:$0xff]  ;;  %v253_v52 = vld [vmem:[#allocation5 + $0x3d8] sm:$0xff] }
  0xe7   :  { %970 = vmatpush1.bf16.msra.mxu0 %v544_v55  ;;  %1185 = vmatpush1.bf16.msra.mxu1 %v546_v56  ;;  %v611_v55 = vunpack.c.l.s8.bf16 %v251_v51  ;;  %v613_v56 = vunpack.c.l.s8.bf16 %v253_v52 }
  0xe8   :  { %971 = vmatprep.subr.bf16.mxu0 %v551_v57  ;;  %1186 = vmatprep.subr.bf16.mxu1 %v553_v58  ;;  %v250_v57 = vld [vmem:[#allocation5 + $0x3c0] sm:$0xff]  ;;  %v252_v58 = vld [vmem:[#allocation5 + $0x3d0] sm:$0xff] }
  0xe9   :  { %v610_v59 = vunpack.c.l.s8.bf16 %v250_v57  ;;  %v612_v60 = vunpack.c.l.s8.bf16 %v252_v58  ;;  %v616_v1 = vunpack.c.h.s8.bf16 %v250_v57  ;;  %v618_v2 = vunpack.c.h.s8.bf16 %v252_v58 }
  0xeb   :  { %972 = vmatpush1.bf16.msra.mxu0 %v550_v61  ;;  %1187 = vmatpush1.bf16.msra.mxu1 %v552_v62  ;;  %v617_v61 = vunpack.c.h.s8.bf16 %v251_v51  ;;  %v619_v62 = vunpack.c.h.s8.bf16 %v253_v52 }
  0xec   :  { %973 = vmatprep.subr.bf16.mxu0 %v557_v63  ;;  %1188 = vmatprep.subr.bf16.mxu1 %v559_v0  ;;  %v257_v63 = vld [vmem:[#allocation5 + $0x3f8] sm:$0xff]  ;;  %v259_v0 = vld [vmem:[#allocation5 + $0x408] sm:$0xff] }
  0xef   :  { %974 = vmatpush1.bf16.msra.mxu0 %v556_v3  ;;  %1189 = vmatpush1.bf16.msra.mxu1 %v558_v4  ;;  %v623_v3 = vunpack.c.l.s8.bf16 %v257_v63  ;;  %v625_v4 = vunpack.c.l.s8.bf16 %v259_v0 }
  0xf0   :  { %986 = vmatprep.subr.bf16.mxu0 %v563_v5  ;;  %1201 = vmatprep.subr.bf16.mxu1 %v565_v6  ;;  %v256_v5 = vld [vmem:[#allocation5 + $0x3f0] sm:$0xff]  ;;  %v258_v6 = vld [vmem:[#allocation5 + $0x400] sm:$0xff] }
  0xf1   :  { %v622_v7 = vunpack.c.l.s8.bf16 %v256_v5  ;;  %v624_v8 = vunpack.c.l.s8.bf16 %v258_v6  ;;  %v630_v14 = vunpack.c.h.s8.bf16 %v258_v6 }
  0xf2   :  { %976 = vmatmul.mubr.bf16.vlgmr.msra.gmra.mrb[0].mxu0 %v2455_v9  ;;  %1191 = vmatmul.mubr.bf16.vlgmr.msra.gmra.mrb[0].mxu1 %v2455_v9  ;;  %v629_v9 = vunpack.c.h.s8.bf16 %v257_v63 }
  0xf3   :  { %987 = vmatpush1.bf16.msra.mxu0 %v562_v10  ;;  %1202 = vmatpush1.bf16.msra.mxu1 %v564_v11  ;;  %v631_v10 = vunpack.c.h.s8.bf16 %v259_v0  ;;  %v263_v11 = vld [vmem:[#allocation5 + $0x428] sm:$0xff] }
  0xf4   :  { %988 = vmatprep.subr.bf16.mxu0 %v569_v12  ;;  %1203 = vmatprep.subr.bf16.mxu1 %v571_v13  ;;  %v265_v12 = vld [vmem:[#allocation5 + $0x438] sm:$0xff]  ;;  %v628_v13 = vunpack.c.h.s8.bf16 %v256_v5  ;;  %v635_v15 = vunpack.c.l.s8.bf16 %v263_v11  ;;  %v641_v21 = vunpack.c.h.s8.bf16 %v263_v11 }
  0xf5   :  { %1018 = vmatprep.mubr.bf16.mxu0 %v2460_v16  ;;  %1233 = vmatprep.mubr.bf16.mxu1 %v2460_v16  ;;  %v637_v16 = vunpack.c.l.s8.bf16 %v265_v12  ;;  %v643_v22 = vunpack.c.h.s8.bf16 %v265_v12 }
  0xf7   :  { %989 = vmatpush1.bf16.msra.mxu0 %v568_v17  ;;  %1204 = vmatpush1.bf16.msra.mxu1 %v570_v18  ;;  %v262_v17 = vld [vmem:[#allocation5 + $0x420] sm:$0xff]  ;;  %v264_v18 = vld [vmem:[#allocation5 + $0x430] sm:$0xff] }
  0xf8   :  { %990 = vmatprep.subr.bf16.mxu0 %v575_v19  ;;  %1205 = vmatprep.subr.bf16.mxu1 %v577_v20  ;;  %v634_v19 = vunpack.c.l.s8.bf16 %v262_v17  ;;  %v636_v20 = vunpack.c.l.s8.bf16 %v264_v18 }
  0xfb   :  { %991 = vmatpush1.bf16.msra.mxu0 %v574_v23  ;;  %1206 = vmatpush1.bf16.msra.mxu1 %v576_v24  ;;  %v269_v23 = vld [vmem:[#allocation5 + $0x458] sm:$0xff]  ;;  %v271_v24 = vld [vmem:[#allocation5 + $0x468] sm:$0xff] }
  0xfc   :  { %992 = vmatprep.subr.bf16.mxu0 %v581_v25  ;;  %1207 = vmatprep.subr.bf16.mxu1 %v583_v26  ;;  %v640_v25 = vunpack.c.h.s8.bf16 %v262_v17  ;;  %v642_v26 = vunpack.c.h.s8.bf16 %v264_v18  ;;  %v647_v27 = vunpack.c.l.s8.bf16 %v269_v23  ;;  %v649_v28 = vunpack.c.l.s8.bf16 %v271_v24 }
  0xfd   :  { %v653_v33 = vunpack.c.h.s8.bf16 %v269_v23  ;;  %v655_v34 = vunpack.c.h.s8.bf16 %v271_v24 }
  0xff   :  { %993 = vmatpush1.bf16.msra.mxu0 %v580_v29  ;;  %1208 = vmatpush1.bf16.msra.mxu1 %v582_v30  ;;  %v268_v29 = vld [vmem:[#allocation5 + $0x450] sm:$0xff]  ;;  %v270_v30 = vld [vmem:[#allocation5 + $0x460] sm:$0xff] }
 0x100   :  { %994 = vmatprep.subr.bf16.mxu0 %v587_v31  ;;  %1209 = vmatprep.subr.bf16.mxu1 %v589_v32  ;;  %v646_v31 = vunpack.c.l.s8.bf16 %v268_v29  ;;  %v648_v32 = vunpack.c.l.s8.bf16 %v270_v30 }
 0x103   :  { %995 = vmatpush1.bf16.msra.mxu0 %v586_v35  ;;  %1210 = vmatpush1.bf16.msra.mxu1 %v588_v36  ;;  %v275_v35 = vld [vmem:[#allocation5 + $0x488] sm:$0xff]  ;;  %v277_v36 = vld [vmem:[#allocation5 + $0x498] sm:$0xff] }
 0x104   :  { %996 = vmatprep.subr.bf16.mxu0 %v593_v37  ;;  %1211 = vmatprep.subr.bf16.mxu1 %v595_v38  ;;  %v652_v37 = vunpack.c.h.s8.bf16 %v268_v29  ;;  %v654_v38 = vunpack.c.h.s8.bf16 %v270_v30  ;;  %v659_v39 = vunpack.c.l.s8.bf16 %v275_v35  ;;  %v661_v40 = vunpack.c.l.s8.bf16 %v277_v36 }
 0x105   :  { %v665_v46 = vunpack.c.h.s8.bf16 %v275_v35 }
 0x107   :  { %997 = vmatpush1.bf16.msra.mxu0 %v592_v41  ;;  %1212 = vmatpush1.bf16.msra.mxu1 %v594_v42  ;;  %v274_v41 = vld [vmem:[#allocation5 + $0x480] sm:$0xff]  ;;  %v276_v42 = vld [vmem:[#allocation5 + $0x490] sm:$0xff] }
 0x108   :  { %998 = vmatprep.subr.bf16.mxu0 %v599_v43  ;;  %1213 = vmatprep.subr.bf16.mxu1 %v601_v44  ;;  %v2458_v43 = vld [vmem:[#allocation2 + $0x10] ss:$40 sps:$4 sm:$0xff]   ;;  %v658_v44 = vunpack.c.l.s8.bf16 %v274_v41  ;;  %v660_v45 = vunpack.c.l.s8.bf16 %v276_v42  ;;  %v664_v51 = vunpack.c.h.s8.bf16 %v274_v41  ;;  %v666_v52 = vunpack.c.h.s8.bf16 %v276_v42 }
 0x10b   :  { %999 = vmatpush1.bf16.msra.mxu0 %v598_v47  ;;  %1214 = vmatpush1.bf16.msra.mxu1 %v600_v48  ;;  %v667_v47 = vunpack.c.h.s8.bf16 %v277_v36  ;;  %v281_v48 = vld [vmem:[#allocation5 + $0x4b8] sm:$0xff] }
 0x10c   :  { %1000 = vmatprep.subr.bf16.mxu0 %v605_v49  ;;  %1215 = vmatprep.subr.bf16.mxu1 %v607_v50  ;;  %v283_v49 = vld [vmem:[#allocation5 + $0x4c8] sm:$0xff] }
 0x10d   :  { %v2463_v50 = vld [vmem:[#allocation2 + $0x1c] ss:$40 sps:$4 sm:$0xff]  }
 0x10f   :  { %1001 = vmatpush1.bf16.msra.mxu0 %v604_v53  ;;  %1216 = vmatpush1.bf16.msra.mxu1 %v606_v54  ;;  %v671_v53 = vunpack.c.l.s8.bf16 %v281_v48  ;;  %v673_v54 = vunpack.c.l.s8.bf16 %v283_v49 }
 0x110   :  { %1002 = vmatprep.subr.bf16.mxu0 %v611_v55  ;;  %1217 = vmatprep.subr.bf16.mxu1 %v613_v56  ;;  %v280_v55 = vld [vmem:[#allocation5 + $0x4b0] sm:$0xff]  ;;  %v282_v56 = vld [vmem:[#allocation5 + $0x4c0] sm:$0xff] }
 0x111   :  { %v670_v57 = vunpack.c.l.s8.bf16 %v280_v55  ;;  %v672_v58 = vunpack.c.l.s8.bf16 %v282_v56  ;;  %v676_v63 = vunpack.c.h.s8.bf16 %v280_v55  ;;  %v678_v0 = vunpack.c.h.s8.bf16 %v282_v56 }
 0x113   :  { %1003 = vmatpush1.bf16.msra.mxu0 %v610_v59  ;;  %1218 = vmatpush1.bf16.msra.mxu1 %v612_v60  ;;  %v677_v59 = vunpack.c.h.s8.bf16 %v281_v48  ;;  %v679_v60 = vunpack.c.h.s8.bf16 %v283_v49 }
 0x114   :  { %1004 = vmatprep.subr.bf16.mxu0 %v617_v61  ;;  %1219 = vmatprep.subr.bf16.mxu1 %v619_v62  ;;  %v287_v61 = vld [vmem:[#allocation5 + $0x4e8] sm:$0xff]  ;;  %v289_v62 = vld [vmem:[#allocation5 + $0x4f8] sm:$0xff] }
 0x117   :  { %1005 = vmatpush1.bf16.msra.mxu0 %v616_v1  ;;  %1220 = vmatpush1.bf16.msra.mxu1 %v618_v2  ;;  %v683_v1 = vunpack.c.l.s8.bf16 %v287_v61  ;;  %v685_v2 = vunpack.c.l.s8.bf16 %v289_v62 }
 0x118   :  { %1006 = vmatprep.subr.bf16.mxu0 %v623_v3  ;;  %1221 = vmatprep.subr.bf16.mxu1 %v625_v4  ;;  %v286_v3 = vld [vmem:[#allocation5 + $0x4e0] sm:$0xff]  ;;  %v288_v4 = vld [vmem:[#allocation5 + $0x4f0] sm:$0xff] }
 0x119   :  { %v682_v5 = vunpack.c.l.s8.bf16 %v286_v3  ;;  %v684_v6 = vunpack.c.l.s8.bf16 %v288_v4  ;;  %v688_v11 = vunpack.c.h.s8.bf16 %v286_v3  ;;  %v690_v12 = vunpack.c.h.s8.bf16 %v288_v4 }
 0x11b   :  { %1007 = vmatpush1.bf16.msra.mxu0 %v622_v7  ;;  %1222 = vmatpush1.bf16.msra.mxu1 %v624_v8  ;;  %v689_v7 = vunpack.c.h.s8.bf16 %v287_v61  ;;  %v691_v8 = vunpack.c.h.s8.bf16 %v289_v62 }
 0x11c   :  { %1008 = vmatprep.subr.bf16.mxu0 %v629_v9  ;;  %1223 = vmatprep.subr.bf16.mxu1 %v631_v10  ;;  %v293_v9 = vld [vmem:[#allocation5 + $0x518] sm:$0xff]  ;;  %v295_v10 = vld [vmem:[#allocation5 + $0x528] sm:$0xff] }
 0x11f   :  { %1009 = vmatpush1.bf16.msra.mxu0 %v628_v13  ;;  %1224 = vmatpush1.bf16.msra.mxu1 %v630_v14  ;;  %v695_v13 = vunpack.c.l.s8.bf16 %v293_v9  ;;  %v697_v14 = vunpack.c.l.s8.bf16 %v295_v10 }
 0x120   :  { %1010 = vmatprep.subr.bf16.mxu0 %v635_v15  ;;  %1225 = vmatprep.subr.bf16.mxu1 %v637_v16  ;;  %v292_v15 = vld [vmem:[#allocation5 + $0x510] sm:$0xff]  ;;  %v294_v16 = vld [vmem:[#allocation5 + $0x520] sm:$0xff] }
 0x121   :  { %v694_v17 = vunpack.c.l.s8.bf16 %v292_v15  ;;  %v696_v18 = vunpack.c.l.s8.bf16 %v294_v16  ;;  %v700_v23 = vunpack.c.h.s8.bf16 %v292_v15  ;;  %v702_v24 = vunpack.c.h.s8.bf16 %v294_v16 }
 0x123   :  { %1011 = vmatpush1.bf16.msra.mxu0 %v634_v19  ;;  %1226 = vmatpush1.bf16.msra.mxu1 %v636_v20  ;;  %v701_v19 = vunpack.c.h.s8.bf16 %v293_v9  ;;  %v703_v20 = vunpack.c.h.s8.bf16 %v295_v10 }
 0x124   :  { %1012 = vmatprep.subr.bf16.mxu0 %v641_v21  ;;  %1227 = vmatprep.subr.bf16.mxu1 %v643_v22  ;;  %v299_v21 = vld [vmem:[#allocation5 + $0x548] sm:$0xff]  ;;  %v301_v22 = vld [vmem:[#allocation5 + $0x558] sm:$0xff] }
 0x127   :  { %1013 = vmatpush1.bf16.msra.mxu0 %v640_v25  ;;  %1228 = vmatpush1.bf16.msra.mxu1 %v642_v26  ;;  %v707_v25 = vunpack.c.l.s8.bf16 %v299_v21  ;;  %v709_v26 = vunpack.c.l.s8.bf16 %v301_v22 }
 0x128   :  { %1014 = vmatprep.subr.bf16.mxu0 %v647_v27  ;;  %1229 = vmatprep.subr.bf16.mxu1 %v649_v28  ;;  %v298_v27 = vld [vmem:[#allocation5 + $0x540] sm:$0xff]  ;;  %v300_v28 = vld [vmem:[#allocation5 + $0x550] sm:$0xff] }
 0x129   :  { %v706_v29 = vunpack.c.l.s8.bf16 %v298_v27  ;;  %v708_v30 = vunpack.c.l.s8.bf16 %v300_v28  ;;  %v712_v35 = vunpack.c.h.s8.bf16 %v298_v27  ;;  %v714_v36 = vunpack.c.h.s8.bf16 %v300_v28 }
 0x12b   :  { %1015 = vmatpush1.bf16.msra.mxu0 %v646_v31  ;;  %1230 = vmatpush1.bf16.msra.mxu1 %v648_v32  ;;  %v713_v31 = vunpack.c.h.s8.bf16 %v299_v21  ;;  %v715_v32 = vunpack.c.h.s8.bf16 %v301_v22 }
 0x12c   :  { %1016 = vmatprep.subr.bf16.mxu0 %v653_v33  ;;  %1231 = vmatprep.subr.bf16.mxu1 %v655_v34  ;;  %v305_v33 = vld [vmem:[#allocation5 + $0x578] sm:$0xff]  ;;  %v307_v34 = vld [vmem:[#allocation5 + $0x588] sm:$0xff] }
 0x12f   :  { %1017 = vmatpush1.bf16.msra.mxu0 %v652_v37  ;;  %1232 = vmatpush1.bf16.msra.mxu1 %v654_v38  ;;  %v719_v37 = vunpack.c.l.s8.bf16 %v305_v33  ;;  %v721_v38 = vunpack.c.l.s8.bf16 %v307_v34 }
 0x130   :  { %1029 = vmatprep.subr.bf16.mxu0 %v659_v39  ;;  %1244 = vmatprep.subr.bf16.mxu1 %v661_v40  ;;  %v304_v39 = vld [vmem:[#allocation5 + $0x570] sm:$0xff]  ;;  %v306_v40 = vld [vmem:[#allocation5 + $0x580] sm:$0xff] }
 0x131   :  { %v718_v41 = vunpack.c.l.s8.bf16 %v304_v39  ;;  %v720_v42 = vunpack.c.l.s8.bf16 %v306_v40  ;;  %v726_v48 = vunpack.c.h.s8.bf16 %v306_v40 }
 0x132   :  { %1019 = vmatmul.mubr.bf16.vlgmr.msra.gmra.mrb[0].mxu0 %v2458_v43  ;;  %1234 = vmatmul.mubr.bf16.vlgmr.msra.gmra.mrb[0].mxu1 %v2458_v43  ;;  %v725_v43 = vunpack.c.h.s8.bf16 %v305_v33 }
 0x133   :  { %1030 = vmatpush1.bf16.msra.mxu0 %v658_v44  ;;  %1245 = vmatpush1.bf16.msra.mxu1 %v660_v45  ;;  %v727_v44 = vunpack.c.h.s8.bf16 %v307_v34  ;;  %v311_v45 = vld [vmem:[#allocation5 + $0x5a8] sm:$0xff] }
 0x134   :  { %1031 = vmatprep.subr.bf16.mxu0 %v665_v46  ;;  %1246 = vmatprep.subr.bf16.mxu1 %v667_v47  ;;  %v313_v46 = vld [vmem:[#allocation5 + $0x5b8] sm:$0xff]  ;;  %v724_v47 = vunpack.c.h.s8.bf16 %v304_v39  ;;  %v731_v49 = vunpack.c.l.s8.bf16 %v311_v45  ;;  %v737_v55 = vunpack.c.h.s8.bf16 %v311_v45 }
 0x135   :  { %1061 = vmatprep.mubr.bf16.mxu0 %v2463_v50  ;;  %1276 = vmatprep.mubr.bf16.mxu1 %v2463_v50  ;;  %v733_v50 = vunpack.c.l.s8.bf16 %v313_v46  ;;  %v739_v56 = vunpack.c.h.s8.bf16 %v313_v46 }
 0x137   :  { %1032 = vmatpush1.bf16.msra.mxu0 %v664_v51  ;;  %1247 = vmatpush1.bf16.msra.mxu1 %v666_v52  ;;  %v310_v51 = vld [vmem:[#allocation5 + $0x5a0] sm:$0xff]  ;;  %v312_v52 = vld [vmem:[#allocation5 + $0x5b0] sm:$0xff] }
 0x138   :  { %1033 = vmatprep.subr.bf16.mxu0 %v671_v53  ;;  %1248 = vmatprep.subr.bf16.mxu1 %v673_v54  ;;  %v730_v53 = vunpack.c.l.s8.bf16 %v310_v51  ;;  %v732_v54 = vunpack.c.l.s8.bf16 %v312_v52 }
 0x13b   :  { %1034 = vmatpush1.bf16.msra.mxu0 %v670_v57  ;;  %1249 = vmatpush1.bf16.msra.mxu1 %v672_v58  ;;  %v317_v57 = vld [vmem:[#allocation5 + $0x5d8] sm:$0xff]  ;;  %v319_v58 = vld [vmem:[#allocation5 + $0x5e8] sm:$0xff] }
 0x13c   :  { %1035 = vmatprep.subr.bf16.mxu0 %v677_v59  ;;  %1250 = vmatprep.subr.bf16.mxu1 %v679_v60  ;;  %v736_v59 = vunpack.c.h.s8.bf16 %v310_v51  ;;  %v738_v60 = vunpack.c.h.s8.bf16 %v312_v52  ;;  %v743_v61 = vunpack.c.l.s8.bf16 %v317_v57  ;;  %v745_v62 = vunpack.c.l.s8.bf16 %v319_v58 }
 0x13d   :  { %v749_v3 = vunpack.c.h.s8.bf16 %v317_v57  ;;  %v751_v4 = vunpack.c.h.s8.bf16 %v319_v58 }
 0x13f   :  { %1036 = vmatpush1.bf16.msra.mxu0 %v676_v63  ;;  %1251 = vmatpush1.bf16.msra.mxu1 %v678_v0  ;;  %v316_v63 = vld [vmem:[#allocation5 + $0x5d0] sm:$0xff]  ;;  %v318_v0 = vld [vmem:[#allocation5 + $0x5e0] sm:$0xff] }
 0x140   :  { %1037 = vmatprep.subr.bf16.mxu0 %v683_v1  ;;  %1252 = vmatprep.subr.bf16.mxu1 %v685_v2  ;;  %v742_v1 = vunpack.c.l.s8.bf16 %v316_v63  ;;  %v744_v2 = vunpack.c.l.s8.bf16 %v318_v0 }
 0x143   :  { %1038 = vmatpush1.bf16.msra.mxu0 %v682_v5  ;;  %1253 = vmatpush1.bf16.msra.mxu1 %v684_v6  ;;  %v323_v5 = vld [vmem:[#allocation5 + $0x608] sm:$0xff]  ;;  %v325_v6 = vld [vmem:[#allocation5 + $0x618] sm:$0xff] }
 0x144   :  { %1039 = vmatprep.subr.bf16.mxu0 %v689_v7  ;;  %1254 = vmatprep.subr.bf16.mxu1 %v691_v8  ;;  %v748_v7 = vunpack.c.h.s8.bf16 %v316_v63  ;;  %v750_v8 = vunpack.c.h.s8.bf16 %v318_v0  ;;  %v755_v9 = vunpack.c.l.s8.bf16 %v323_v5  ;;  %v757_v10 = vunpack.c.l.s8.bf16 %v325_v6 }
 0x145   :  { %v761_v16 = vunpack.c.h.s8.bf16 %v323_v5 }
 0x147   :  { %1040 = vmatpush1.bf16.msra.mxu0 %v688_v11  ;;  %1255 = vmatpush1.bf16.msra.mxu1 %v690_v12  ;;  %v322_v11 = vld [vmem:[#allocation5 + $0x600] sm:$0xff]  ;;  %v324_v12 = vld [vmem:[#allocation5 + $0x610] sm:$0xff] }
 0x148   :  { %1041 = vmatprep.subr.bf16.mxu0 %v695_v13  ;;  %1256 = vmatprep.subr.bf16.mxu1 %v697_v14  ;;  %v2461_v13 = vld [vmem:[#allocation2 + $0x18] ss:$40 sps:$4 sm:$0xff]   ;;  %v754_v14 = vunpack.c.l.s8.bf16 %v322_v11  ;;  %v756_v15 = vunpack.c.l.s8.bf16 %v324_v12  ;;  %v760_v21 = vunpack.c.h.s8.bf16 %v322_v11  ;;  %v762_v22 = vunpack.c.h.s8.bf16 %v324_v12 }
 0x14b   :  { %1042 = vmatpush1.bf16.msra.mxu0 %v694_v17  ;;  %1257 = vmatpush1.bf16.msra.mxu1 %v696_v18  ;;  %v763_v17 = vunpack.c.h.s8.bf16 %v325_v6  ;;  %v329_v18 = vld [vmem:[#allocation5 + $0x638] sm:$0xff] }
 0x14c   :  { %1043 = vmatprep.subr.bf16.mxu0 %v701_v19  ;;  %1258 = vmatprep.subr.bf16.mxu1 %v703_v20  ;;  %v331_v19 = vld [vmem:[#allocation5 + $0x648] sm:$0xff]  ;;  %v2466_v20 = vld [vmem:[#allocation2 + $0x24] ss:$40 sps:$4 sm:$0xff]  }
 0x14f   :  { %1044 = vmatpush1.bf16.msra.mxu0 %v700_v23  ;;  %1259 = vmatpush1.bf16.msra.mxu1 %v702_v24  ;;  %v767_v23 = vunpack.c.l.s8.bf16 %v329_v18  ;;  %v769_v24 = vunpack.c.l.s8.bf16 %v331_v19 }
 0x150   :  { %1045 = vmatprep.subr.bf16.mxu0 %v707_v25  ;;  %1260 = vmatprep.subr.bf16.mxu1 %v709_v26  ;;  %v328_v25 = vld [vmem:[#allocation5 + $0x630] sm:$0xff]  ;;  %v330_v26 = vld [vmem:[#allocation5 + $0x640] sm:$0xff] }
 0x151   :  { %v766_v27 = vunpack.c.l.s8.bf16 %v328_v25  ;;  %v768_v28 = vunpack.c.l.s8.bf16 %v330_v26  ;;  %v772_v33 = vunpack.c.h.s8.bf16 %v328_v25  ;;  %v774_v34 = vunpack.c.h.s8.bf16 %v330_v26 }
 0x153   :  { %1046 = vmatpush1.bf16.msra.mxu0 %v706_v29  ;;  %1261 = vmatpush1.bf16.msra.mxu1 %v708_v30  ;;  %v773_v29 = vunpack.c.h.s8.bf16 %v329_v18  ;;  %v775_v30 = vunpack.c.h.s8.bf16 %v331_v19 }
 0x154   :  { %1047 = vmatprep.subr.bf16.mxu0 %v713_v31  ;;  %1262 = vmatprep.subr.bf16.mxu1 %v715_v32  ;;  %v335_v31 = vld [vmem:[#allocation5 + $0x668] sm:$0xff]  ;;  %v337_v32 = vld [vmem:[#allocation5 + $0x678] sm:$0xff] }
 0x157   :  { %1048 = vmatpush1.bf16.msra.mxu0 %v712_v35  ;;  %1263 = vmatpush1.bf16.msra.mxu1 %v714_v36  ;;  %v779_v35 = vunpack.c.l.s8.bf16 %v335_v31  ;;  %v781_v36 = vunpack.c.l.s8.bf16 %v337_v32 }
 0x158   :  { %1049 = vmatprep.subr.bf16.mxu0 %v719_v37  ;;  %1264 = vmatprep.subr.bf16.mxu1 %v721_v38  ;;  %v334_v37 = vld [vmem:[#allocation5 + $0x660] sm:$0xff]  ;;  %v336_v38 = vld [vmem:[#allocation5 + $0x670] sm:$0xff] }
 0x159   :  { %v778_v39 = vunpack.c.l.s8.bf16 %v334_v37  ;;  %v780_v40 = vunpack.c.l.s8.bf16 %v336_v38  ;;  %v784_v45 = vunpack.c.h.s8.bf16 %v334_v37  ;;  %v786_v46 = vunpack.c.h.s8.bf16 %v336_v38 }
 0x15b   :  { %1050 = vmatpush1.bf16.msra.mxu0 %v718_v41  ;;  %1265 = vmatpush1.bf16.msra.mxu1 %v720_v42  ;;  %v785_v41 = vunpack.c.h.s8.bf16 %v335_v31  ;;  %v787_v42 = vunpack.c.h.s8.bf16 %v337_v32 }
 0x15c   :  { %1051 = vmatprep.subr.bf16.mxu0 %v725_v43  ;;  %1266 = vmatprep.subr.bf16.mxu1 %v727_v44  ;;  %v341_v43 = vld [vmem:[#allocation5 + $0x698] sm:$0xff]  ;;  %v343_v44 = vld [vmem:[#allocation5 + $0x6a8] sm:$0xff] }
 0x15f   :  { %1052 = vmatpush1.bf16.msra.mxu0 %v724_v47  ;;  %1267 = vmatpush1.bf16.msra.mxu1 %v726_v48  ;;  %v791_v47 = vunpack.c.l.s8.bf16 %v341_v43  ;;  %v793_v48 = vunpack.c.l.s8.bf16 %v343_v44 }
 0x160   :  { %1053 = vmatprep.subr.bf16.mxu0 %v731_v49  ;;  %1268 = vmatprep.subr.bf16.mxu1 %v733_v50  ;;  %v340_v49 = vld [vmem:[#allocation5 + $0x690] sm:$0xff]  ;;  %v342_v50 = vld [vmem:[#allocation5 + $0x6a0] sm:$0xff] }
 0x161   :  { %v790_v51 = vunpack.c.l.s8.bf16 %v340_v49  ;;  %v792_v52 = vunpack.c.l.s8.bf16 %v342_v50  ;;  %v796_v57 = vunpack.c.h.s8.bf16 %v340_v49  ;;  %v798_v58 = vunpack.c.h.s8.bf16 %v342_v50  ;;  %v2491_v49 = vld [vmem:[#allocation2 + $0x4] ss:$40 sps:$4 sm:$0xff]  }
 0x163   :  { %1054 = vmatpush1.bf16.msra.mxu0 %v730_v53  ;;  %1269 = vmatpush1.bf16.msra.mxu1 %v732_v54  ;;  %v797_v53 = vunpack.c.h.s8.bf16 %v341_v43  ;;  %v799_v54 = vunpack.c.h.s8.bf16 %v343_v44  ;;  %v134_v43 = vld [vmem:[#allocation5 + $0x20] sm:$0xff]  ;;  %v2464_v44 = vld [vmem:[#allocation2 + $0x20] ss:$40 sps:$4 sm:$0xff]  }
 0x164   :  { %1055 = vmatprep.subr.bf16.mxu0 %v737_v55  ;;  %1270 = vmatprep.subr.bf16.mxu1 %v739_v56  ;;  %v347_v55 = vld [vmem:[#allocation5 + $0x6c8] sm:$0xff]  ;;  %v349_v56 = vld [vmem:[#allocation5 + $0x6d8] sm:$0xff] }
 0x167   :  { %1056 = vmatpush1.bf16.msra.mxu0 %v736_v59  ;;  %1271 = vmatpush1.bf16.msra.mxu1 %v738_v60  ;;  %v803_v59 = vunpack.c.l.s8.bf16 %v347_v55  ;;  %v805_v60 = vunpack.c.l.s8.bf16 %v349_v56 }
 0x168   :  { %1057 = vmatprep.subr.bf16.mxu0 %v743_v61  ;;  %1272 = vmatprep.subr.bf16.mxu1 %v745_v62  ;;  %v346_v61 = vld [vmem:[#allocation5 + $0x6c0] sm:$0xff]  ;;  %v348_v62 = vld [vmem:[#allocation5 + $0x6d0] sm:$0xff] }
 0x169   :  { %v802_v63 = vunpack.c.l.s8.bf16 %v346_v61  ;;  %v804_v0 = vunpack.c.l.s8.bf16 %v348_v62  ;;  %v808_v5 = vunpack.c.h.s8.bf16 %v346_v61  ;;  %v810_v6 = vunpack.c.h.s8.bf16 %v348_v62 }
 0x16b   :  { %1058 = vmatpush1.bf16.msra.mxu0 %v742_v1  ;;  %1273 = vmatpush1.bf16.msra.mxu1 %v744_v2  ;;  %v809_v1 = vunpack.c.h.s8.bf16 %v347_v55  ;;  %v811_v2 = vunpack.c.h.s8.bf16 %v349_v56 }
 0x16c   :  { %1059 = vmatprep.subr.bf16.mxu0 %v749_v3  ;;  %1274 = vmatprep.subr.bf16.mxu1 %v751_v4  ;;  %v353_v3 = vld [vmem:[#allocation5 + $0x6f8] sm:$0xff]  ;;  %v355_v4 = vld [vmem:[#allocation5 + $0x708] sm:$0xff] }
 0x16f   :  { %1060 = vmatpush1.bf16.msra.mxu0 %v748_v7  ;;  %1275 = vmatpush1.bf16.msra.mxu1 %v750_v8  ;;  %v815_v7 = vunpack.c.l.s8.bf16 %v353_v3  ;;  %v817_v8 = vunpack.c.l.s8.bf16 %v355_v4 }
 0x170   :  { %1072 = vmatprep.subr.bf16.mxu0 %v755_v9  ;;  %1287 = vmatprep.subr.bf16.mxu1 %v757_v10  ;;  %v352_v9 = vld [vmem:[#allocation5 + $0x6f0] sm:$0xff]  ;;  %v354_v10 = vld [vmem:[#allocation5 + $0x700] sm:$0xff] }
 0x171   :  { %v814_v11 = vunpack.c.l.s8.bf16 %v352_v9  ;;  %v816_v12 = vunpack.c.l.s8.bf16 %v354_v10  ;;  %v822_v18 = vunpack.c.h.s8.bf16 %v354_v10 }
 0x172   :  { %1062 = vmatmul.mubr.bf16.vlgmr.msra.gmra.mrb[0].mxu0 %v2461_v13  ;;  %1277 = vmatmul.mubr.bf16.vlgmr.msra.gmra.mrb[0].mxu1 %v2461_v13  ;;  %v821_v13 = vunpack.c.h.s8.bf16 %v353_v3 }
 0x173   :  { %1073 = vmatpush1.bf16.msra.mxu0 %v754_v14  ;;  %1288 = vmatpush1.bf16.msra.mxu1 %v756_v15  ;;  %v823_v14 = vunpack.c.h.s8.bf16 %v355_v4  ;;  %v359_v15 = vld [vmem:[#allocation5 + $0x728] sm:$0xff] }
 0x174   :  { %1074 = vmatprep.subr.bf16.mxu0 %v761_v16  ;;  %1289 = vmatprep.subr.bf16.mxu1 %v763_v17  ;;  %v361_v16 = vld [vmem:[#allocation5 + $0x738] sm:$0xff]  ;;  %v820_v17 = vunpack.c.h.s8.bf16 %v352_v9  ;;  %v827_v19 = vunpack.c.l.s8.bf16 %v359_v15  ;;  %v833_v25 = vunpack.c.h.s8.bf16 %v359_v15  ;;  %v1645_v9 = vld [vmem:[#allocation8] sm:$0xff] }
 0x175   :  { %1104 = vmatprep.mubr.bf16.mxu0 %v2466_v20  ;;  %1319 = vmatprep.mubr.bf16.mxu1 %v2466_v20  ;;  %v829_v20 = vunpack.c.l.s8.bf16 %v361_v16  ;;  %v835_v26 = vunpack.c.h.s8.bf16 %v361_v16  ;;  %v164_v16 = vld [vmem:[#allocation5 + $0x110] sm:$0xff] }
 0x177   :  { %1075 = vmatpush1.bf16.msra.mxu0 %v760_v21  ;;  %1290 = vmatpush1.bf16.msra.mxu1 %v762_v22  ;;  %v358_v21 = vld [vmem:[#allocation5 + $0x720] sm:$0xff]  ;;  %v360_v22 = vld [vmem:[#allocation5 + $0x730] sm:$0xff] }
 0x178   :  { %1076 = vmatprep.subr.bf16.mxu0 %v767_v23  ;;  %1291 = vmatprep.subr.bf16.mxu1 %v769_v24  ;;  %v826_v23 = vunpack.c.l.s8.bf16 %v358_v21  ;;  %v828_v24 = vunpack.c.l.s8.bf16 %v360_v22 }
 0x17b   :  { %1077 = vmatpush1.bf16.msra.mxu0 %v766_v27  ;;  %1292 = vmatpush1.bf16.msra.mxu1 %v768_v28  ;;  %v365_v27 = vld [vmem:[#allocation5 + $0x758] sm:$0xff]  ;;  %v367_v28 = vld [vmem:[#allocation5 + $0x768] sm:$0xff] }
 0x17c   :  { %1078 = vmatprep.subr.bf16.mxu0 %v773_v29  ;;  %1293 = vmatprep.subr.bf16.mxu1 %v775_v30  ;;  %v832_v29 = vunpack.c.h.s8.bf16 %v358_v21  ;;  %v834_v30 = vunpack.c.h.s8.bf16 %v360_v22  ;;  %v839_v31 = vunpack.c.l.s8.bf16 %v365_v27  ;;  %v841_v32 = vunpack.c.l.s8.bf16 %v367_v28  ;;  %v1647_v21 = vld [vmem:[#allocation8 + $0x10] sm:$0xff] }
 0x17d   :  { %v845_v37 = vunpack.c.h.s8.bf16 %v365_v27  ;;  %v847_v38 = vunpack.c.h.s8.bf16 %v367_v28  ;;  %v170_v28 = vld [vmem:[#allocation5 + $0x140] sm:$0xff] }
 0x17f   :  { %1079 = vmatpush1.bf16.msra.mxu0 %v772_v33  ;;  %1294 = vmatpush1.bf16.msra.mxu1 %v774_v34  ;;  %v364_v33 = vld [vmem:[#allocation5 + $0x750] sm:$0xff]  ;;  %v366_v34 = vld [vmem:[#allocation5 + $0x760] sm:$0xff] }
 0x180   :  { %1080 = vmatprep.subr.bf16.mxu0 %v779_v35  ;;  %1295 = vmatprep.subr.bf16.mxu1 %v781_v36  ;;  %v838_v35 = vunpack.c.l.s8.bf16 %v364_v33  ;;  %v840_v36 = vunpack.c.l.s8.bf16 %v366_v34 }
 0x183   :  { %1081 = vmatpush1.bf16.msra.mxu0 %v778_v39  ;;  %1296 = vmatpush1.bf16.msra.mxu1 %v780_v40  ;;  %v135_v39 = vld [vmem:[#allocation5 + $0x28] sm:$0xff]  ;;  %v844_v40 = vunpack.c.h.s8.bf16 %v364_v33 }
 0x184   :  { %1082 = vmatprep.subr.bf16.mxu0 %v785_v41  ;;  %1297 = vmatprep.subr.bf16.mxu1 %v787_v42  ;;  %v846_v41 = vunpack.c.h.s8.bf16 %v366_v34  ;;  %v375_v42 = vunpack.c.l.s8.bf16 %v135_v39  ;;  %v1649_v33 = vld [vmem:[#allocation8 + $0x20] sm:$0xff] }
 0x187   :  { %1083 = vmatpush1.bf16.msra.mxu0 %v784_v45  ;;  %1298 = vmatpush1.bf16.msra.mxu1 %v786_v46  ;;  %v374_v45 = vunpack.c.l.s8.bf16 %v134_v43  ;;  %v381_v46 = vunpack.c.h.s8.bf16 %v135_v39 }
 0x188   :  { %1084 = vmatprep.subr.bf16.mxu0 %v791_v47  ;;  %1299 = vmatprep.subr.bf16.mxu1 %v793_v48  ;;  %v141_v47 = vld [vmem:[#allocation5 + $0x58] sm:$0xff]  ;;  %v380_v48 = vunpack.c.h.s8.bf16 %v134_v43 }
 0x189   :  { %v387_v50 = vunpack.c.l.s8.bf16 %v141_v47 }
 0x18b   :  { %1085 = vmatpush1.bf16.msra.mxu0 %v790_v51  ;;  %1300 = vmatpush1.bf16.msra.mxu1 %v792_v52  ;;  %v140_v51 = vld [vmem:[#allocation5 + $0x50] sm:$0xff] }
 0x18c   :  { %1086 = vmatprep.subr.bf16.mxu0 %v797_v53  ;;  %1301 = vmatprep.subr.bf16.mxu1 %v799_v54  ;;  %v386_v52 = vunpack.c.l.s8.bf16 %v140_v51  ;;  %v393_v53 = vunpack.c.h.s8.bf16 %v141_v47  ;;  %v147_v54 = vld [vmem:[#allocation5 + $0x88] sm:$0xff]  ;;  %v392_v55 = vunpack.c.h.s8.bf16 %v140_v51 }
 0x18d   :  { %v399_v56 = vunpack.c.l.s8.bf16 %v147_v54 }
 0x18f   :  { %1087 = vmatpush1.bf16.msra.mxu0 %v796_v57  ;;  %1302 = vmatpush1.bf16.msra.mxu1 %v798_v58  ;;  %v146_v57 = vld [vmem:[#allocation5 + $0x80] sm:$0xff] }
 0x190   :  { %1088 = vmatprep.subr.bf16.mxu0 %v803_v59  ;;  %1303 = vmatprep.subr.bf16.mxu1 %v805_v60  ;;  %v398_v58 = vunpack.c.l.s8.bf16 %v146_v57  ;;  %v405_v59 = vunpack.c.h.s8.bf16 %v147_v54  ;;  %v153_v60 = vld [vmem:[#allocation5 + $0xb8] sm:$0xff]  ;;  %v404_v61 = vunpack.c.h.s8.bf16 %v146_v57  ;;  %v1654_v54 = vld [vmem:[#allocation8 + $0x48] sm:$0xff]  ;;  %v1653_v57 = vld [vmem:[#allocation8 + $0x40] sm:$0xff] }
 0x191   :  { %v411_v62 = vunpack.c.l.s8.bf16 %v153_v60 }
 0x193   :  { %1089 = vmatpush1.bf16.msra.mxu0 %v802_v63  ;;  %1304 = vmatpush1.bf16.msra.mxu1 %v804_v0  ;;  %v152_v63 = vld [vmem:[#allocation5 + $0xb0] sm:$0xff] }
 0x194   :  { %1090 = vmatprep.subr.bf16.mxu0 %v809_v1  ;;  %1305 = vmatprep.subr.bf16.mxu1 %v811_v2  ;;  %v410_v0 = vunpack.c.l.s8.bf16 %v152_v63  ;;  %v417_v1 = vunpack.c.h.s8.bf16 %v153_v60  ;;  %v159_v2 = vld [vmem:[#allocation5 + $0xe8] sm:$0xff]  ;;  %v416_v3 = vunpack.c.h.s8.bf16 %v152_v63  ;;  %v189_v60 = vld [vmem:[#allocation5 + $0x1d8] sm:$0xff] }
 0x195   :  { %v423_v4 = vunpack.c.l.s8.bf16 %v159_v2  ;;  %v429_v10 = vunpack.c.h.s8.bf16 %v159_v2  ;;  %v2493_v63 = vld [vmem:[#allocation2 + $0xc] ss:$40 sps:$4 sm:$0xff]   ;;  %v188_v2 = vld [vmem:[#allocation5 + $0x1d0] sm:$0xff] }
 0x197   :  { %1091 = vmatpush1.bf16.msra.mxu0 %v808_v5  ;;  %1306 = vmatpush1.bf16.msra.mxu1 %v810_v6  ;;  %v158_v5 = vld [vmem:[#allocation5 + $0xe0] sm:$0xff]  ;;  %v1646_v6 = vld [vmem:[#allocation8 + $0x8] sm:$0xff] }
 0x198   :  { %1092 = vmatprep.subr.bf16.mxu0 %v815_v7  ;;  %1307 = vmatprep.subr.bf16.mxu1 %v817_v8  ;;  %v422_v7 = vunpack.c.l.s8.bf16 %v158_v5  ;;  %v1694_v8 = vunpack.c.l.s8.bf16 %v1646_v6 }
 0x19b   :  { %1093 = vmatpush1.bf16.msra.mxu0 %v814_v11  ;;  %1308 = vmatpush1.bf16.msra.mxu1 %v816_v12  ;;  %v1693_v11 = vunpack.c.l.s8.bf16 %v1645_v9  ;;  %v165_v12 = vld [vmem:[#allocation5 + $0x118] sm:$0xff] }
 0x19c   :  { %1094 = vmatprep.subr.bf16.mxu0 %v821_v13  ;;  %1309 = vmatprep.subr.bf16.mxu1 %v823_v14  ;;  %v428_v13 = vunpack.c.h.s8.bf16 %v158_v5  ;;  %v1696_v14 = vunpack.c.h.s8.bf16 %v1646_v6  ;;  %v435_v15 = vunpack.c.l.s8.bf16 %v165_v12  ;;  %v441_v22 = vunpack.c.h.s8.bf16 %v165_v12 }
 0x19d   :  { %v482_v5 = vunpack.c.l.s8.bf16 %v188_v2 }
 0x19f   :  { %1095 = vmatpush1.bf16.msra.mxu0 %v820_v17  ;;  %1310 = vmatpush1.bf16.msra.mxu1 %v822_v18  ;;  %v1695_v17 = vunpack.c.h.s8.bf16 %v1645_v9  ;;  %v1648_v18 = vld [vmem:[#allocation8 + $0x18] sm:$0xff] }
 0x1a0   :  { %1096 = vmatprep.subr.bf16.mxu0 %v827_v19  ;;  %1311 = vmatprep.subr.bf16.mxu1 %v829_v20  ;;  %v434_v19 = vunpack.c.l.s8.bf16 %v164_v16  ;;  %v1698_v20 = vunpack.c.l.s8.bf16 %v1648_v18 }
 0x1a3   :  { %1097 = vmatpush1.bf16.msra.mxu0 %v826_v23  ;;  %1312 = vmatpush1.bf16.msra.mxu1 %v828_v24  ;;  %v1697_v23 = vunpack.c.l.s8.bf16 %v1647_v21  ;;  %v171_v24 = vld [vmem:[#allocation5 + $0x148] sm:$0xff] }
 0x1a4   :  { %1098 = vmatprep.subr.bf16.mxu0 %v833_v25  ;;  %1313 = vmatprep.subr.bf16.mxu1 %v835_v26  ;;  %v440_v25 = vunpack.c.h.s8.bf16 %v164_v16  ;;  %v1700_v26 = vunpack.c.h.s8.bf16 %v1648_v18  ;;  %v447_v27 = vunpack.c.l.s8.bf16 %v171_v24  ;;  %v453_v34 = vunpack.c.h.s8.bf16 %v171_v24  ;;  %v1658_v16 = vld [vmem:[#allocation8 + $0x68] sm:$0xff] }
 0x1a5   :  { %v1718_v18 = vunpack.c.l.s8.bf16 %v1658_v16  ;;  %v1720_v24 = vunpack.c.h.s8.bf16 %v1658_v16 }
 0x1a7   :  { %1099 = vmatpush1.bf16.msra.mxu0 %v832_v29  ;;  %1314 = vmatpush1.bf16.msra.mxu1 %v834_v30  ;;  %v1699_v29 = vunpack.c.h.s8.bf16 %v1647_v21  ;;  %v1650_v30 = vld [vmem:[#allocation8 + $0x28] sm:$0xff] }
 0x1a8   :  { %1100 = vmatprep.subr.bf16.mxu0 %v839_v31  ;;  %1315 = vmatprep.subr.bf16.mxu1 %v841_v32  ;;  %v446_v31 = vunpack.c.l.s8.bf16 %v170_v28  ;;  %v1702_v32 = vunpack.c.l.s8.bf16 %v1650_v30 }
 0x1ab   :  { %1101 = vmatpush1.bf16.msra.mxu0 %v838_v35  ;;  %1316 = vmatpush1.bf16.msra.mxu1 %v840_v36  ;;  %v1701_v35 = vunpack.c.l.s8.bf16 %v1649_v33  ;;  %v177_v36 = vld [vmem:[#allocation5 + $0x178] sm:$0xff] }
 0x1ac   :  { %1102 = vmatprep.subr.bf16.mxu0 %v845_v37  ;;  %1317 = vmatprep.subr.bf16.mxu1 %v847_v38  ;;  %v452_v37 = vunpack.c.h.s8.bf16 %v170_v28  ;;  %v1704_v38 = vunpack.c.h.s8.bf16 %v1650_v30  ;;  %v459_v39 = vunpack.c.l.s8.bf16 %v177_v36  ;;  %v1660_v28 = vld [vmem:[#allocation8 + $0x78] sm:$0xff] }
 0x1ad   :  { %v1722_v30 = vunpack.c.l.s8.bf16 %v1660_v28 }
 0x1af   :  { %1103 = vmatpush1.bf16.msra.mxu0 %v844_v40  ;;  %1318 = vmatpush1.bf16.msra.mxu1 %v846_v41  ;;  %v176_v40 = vld [vmem:[#allocation5 + $0x170] sm:$0xff]  ;;  %v1703_v41 = vunpack.c.h.s8.bf16 %v1649_v33 }
 0x1b0   :  { %1330 = vmatprep.subr.bf16.mxu0 %v375_v42  ;;  %1795 = vmatprep.subr.bf16.mxu1 %v1694_v8  ;;  %v1652_v42 = vld [vmem:[#allocation8 + $0x38] sm:$0xff]  ;;  %v458_v43 = vunpack.c.l.s8.bf16 %v176_v40  ;;  %v489_v8 = vunpack.c.h.s8.bf16 %v189_v60 }
 0x1b2   :  { %1105 = vmatmul.mubr.bf16.vlgmr.msra.gmra.mrb[0].mxu0 %v2464_v44  ;;  %1320 = vmatmul.mubr.bf16.vlgmr.msra.gmra.mrb[0].mxu1 %v2464_v44  ;;  %v1706_v44 = vunpack.c.l.s8.bf16 %v1652_v42 }
 0x1b3   :  { %1331 = vmatpush1.bf16.msra.mxu0 %v374_v45  ;;  %1362 = vmatprep.mubr.bf16.mxu0 %v2491_v49  ;;  %v1651_v45 = vld [vmem:[#allocation8 + $0x30] sm:$0xff]  ;;  %v464_v49 = vunpack.c.h.s8.bf16 %v176_v40  ;;  %v2820_v40 = vld [vmem:[#allocation8 + $0x88] sm:$0xff] }
 0x1b4   :  { %1332 = vmatprep.subr.bf16.mxu0 %v381_v46  ;;  %1796 = vmatpush1.bf16.msra.mxu1 %v1693_v11  ;;  %v465_v46 = vunpack.c.h.s8.bf16 %v177_v36  ;;  %v1705_v47 = vunpack.c.l.s8.bf16 %v1651_v45  ;;  %v488_v11 = vunpack.c.h.s8.bf16 %v188_v2  ;;  %v1724_v36 = vunpack.c.h.s8.bf16 %v1660_v28 }
 0x1b5   :  { %1797 = vmatprep.subr.bf16.mxu1 %v1696_v14  ;;  %v194_v14 = vld [vmem:[#allocation5 + $0x200] sm:$0xff] }
 0x1b7   :  { %1333 = vmatpush1.bf16.msra.mxu0 %v380_v48  ;;  %v183_v48 = vld [vmem:[#allocation5 + $0x1a8] sm:$0xff] }
 0x1b8   :  { %1334 = vmatprep.subr.bf16.mxu0 %v387_v50  ;;  %1798 = vmatpush1.bf16.msra.mxu1 %v1695_v17  ;;  %v1708_v50 = vunpack.c.h.s8.bf16 %v1652_v42  ;;  %v471_v51 = vunpack.c.l.s8.bf16 %v183_v48  ;;  %v494_v17 = vunpack.c.l.s8.bf16 %v194_v14  ;;  %v1726_v42 = vunpack.c.l.s8.bf16 %v2820_v40 }
 0x1b9   :  { %1799 = vmatprep.subr.bf16.mxu1 %v1698_v20 }
 0x1bb   :  { %1335 = vmatpush1.bf16.msra.mxu0 %v386_v52  ;;  %v182_v52 = vld [vmem:[#allocation5 + $0x1a0] sm:$0xff] }
 0x1bc   :  { %1336 = vmatprep.subr.bf16.mxu0 %v393_v53  ;;  %1800 = vmatpush1.bf16.msra.mxu1 %v1697_v23  ;;  %v1707_v53 = vunpack.c.h.s8.bf16 %v1651_v45  ;;  %v500_v23 = vunpack.c.h.s8.bf16 %v194_v14 }
 0x1bd   :  { %1801 = vmatprep.subr.bf16.mxu1 %v1700_v26  ;;  %v200_v26 = vld [vmem:[#allocation5 + $0x230] sm:$0xff] }
 0x1bf   :  { %1337 = vmatpush1.bf16.msra.mxu0 %v392_v55  ;;  %v470_v55 = vunpack.c.l.s8.bf16 %v182_v52 }
 0x1c0   :  { %1338 = vmatprep.subr.bf16.mxu0 %v399_v56  ;;  %1802 = vmatpush1.bf16.msra.mxu1 %v1699_v29  ;;  %v1710_v56 = vunpack.c.l.s8.bf16 %v1654_v54  ;;  %v506_v29 = vunpack.c.l.s8.bf16 %v200_v26 }
 0x1c1   :  { %1803 = vmatprep.subr.bf16.mxu1 %v1702_v32 }
 0x1c3   :  { %1339 = vmatpush1.bf16.msra.mxu0 %v398_v58  ;;  %v477_v58 = vunpack.c.h.s8.bf16 %v183_v48 }
 0x1c4   :  { %1340 = vmatprep.subr.bf16.mxu0 %v405_v59  ;;  %1804 = vmatpush1.bf16.msra.mxu1 %v1701_v35  ;;  %v1709_v59 = vunpack.c.l.s8.bf16 %v1653_v57  ;;  %v512_v35 = vunpack.c.h.s8.bf16 %v200_v26 }
 0x1c5   :  { %1805 = vmatprep.subr.bf16.mxu1 %v1704_v38  ;;  %v206_v38 = vld [vmem:[#allocation5 + $0x260] sm:$0xff] }
 0x1c6   :  { %v524_v45 = vunpack.c.h.s8.bf16 %v206_v38 }
 0x1c7   :  { %1341 = vmatpush1.bf16.msra.mxu0 %v404_v61  ;;  %v2492_v61 = vld [vmem:[#allocation2] ss:$40 sps:$4 sm:$0xff]  }
 0x1c8   :  { %1342 = vmatprep.subr.bf16.mxu0 %v411_v62  ;;  %1806 = vmatpush1.bf16.msra.mxu1 %v1703_v41  ;;  %v476_v62 = vunpack.c.h.s8.bf16 %v182_v52  ;;  %v518_v41 = vunpack.c.l.s8.bf16 %v206_v38 }
 0x1c9   :  { %1807 = vmatprep.subr.bf16.mxu1 %v1706_v44  ;;  %v213_v44 = vld [vmem:[#allocation5 + $0x298] sm:$0xff] }
 0x1cb   :  { %1343 = vmatpush1.bf16.msra.mxu0 %v410_v0  ;;  %v1712_v0 = vunpack.c.h.s8.bf16 %v1654_v54 }
 0x1cc   :  { %1344 = vmatprep.subr.bf16.mxu0 %v417_v1  ;;  %1808 = vmatpush1.bf16.msra.mxu1 %v1705_v47  ;;  %v483_v1 = vunpack.c.l.s8.bf16 %v189_v60  ;;  %v212_v47 = vld [vmem:[#allocation5 + $0x290] sm:$0xff] }
 0x1cd   :  { %1809 = vmatprep.subr.bf16.mxu1 %v1708_v50  ;;  %v530_v48 = vunpack.c.l.s8.bf16 %v212_v47  ;;  %v219_v50 = vld [vmem:[#allocation5 + $0x2c8] sm:$0xff] }
 0x1ce   :  { %v543_v52 = vunpack.c.l.s8.bf16 %v219_v50 }
 0x1cf   :  { %1345 = vmatpush1.bf16.msra.mxu0 %v416_v3  ;;  %v1711_v3 = vunpack.c.h.s8.bf16 %v1653_v57 }
 0x1d0   :  { %1346 = vmatprep.subr.bf16.mxu0 %v423_v4  ;;  %1810 = vmatpush1.bf16.msra.mxu1 %v1707_v53  ;;  %v1656_v4 = vld [vmem:[#allocation8 + $0x58] sm:$0xff] }
 0x1d1   :  { %1811 = vmatprep.subr.bf16.mxu1 %v1710_v56  ;;  %v1714_v6 = vunpack.c.l.s8.bf16 %v1656_v4  ;;  %v1716_v12 = vunpack.c.h.s8.bf16 %v1656_v4  ;;  %v218_v53 = vld [vmem:[#allocation5 + $0x2c0] sm:$0xff]  ;;  %v225_v56 = vld [vmem:[#allocation5 + $0x2f8] sm:$0xff] }
 0x1d2   :  { %v542_v54 = vunpack.c.l.s8.bf16 %v218_v53  ;;  %v548_v57 = vunpack.c.h.s8.bf16 %v218_v53  ;;  %v237_v4 = vld [vmem:[#allocation5 + $0x358] sm:$0xff] }
 0x1d3   :  { %1347 = vmatpush1.bf16.msra.mxu0 %v422_v7  ;;  %v1655_v7 = vld [vmem:[#allocation8 + $0x50] sm:$0xff] }
 0x1d4   :  { %1348 = vmatprep.subr.bf16.mxu0 %v429_v10  ;;  %1812 = vmatpush1.bf16.msra.mxu1 %v1709_v59  ;;  %v1713_v9 = vunpack.c.l.s8.bf16 %v1655_v7  ;;  %v195_v10 = vld [vmem:[#allocation5 + $0x208] sm:$0xff]  ;;  %v224_v59 = vld [vmem:[#allocation5 + $0x2f0] sm:$0xff] }
 0x1d5   :  { %1813 = vmatprep.subr.bf16.mxu1 %v1712_v0  ;;  %v501_v20 = vunpack.c.h.s8.bf16 %v195_v10  ;;  %v554_v60 = vunpack.c.l.s8.bf16 %v224_v59 }
 0x1d7   :  { %1349 = vmatpush1.bf16.msra.mxu0 %v428_v13  ;;  %v495_v13 = vunpack.c.l.s8.bf16 %v195_v10 }
 0x1d8   :  { %1350 = vmatprep.subr.bf16.mxu0 %v435_v15  ;;  %1814 = vmatpush1.bf16.msra.mxu1 %v1711_v3  ;;  %v1715_v15 = vunpack.c.h.s8.bf16 %v1655_v7  ;;  %v2495_v7 = vld [vmem:[#allocation2 + $0x14] ss:$40 sps:$4 sm:$0xff]  }
 0x1d9   :  { %1815 = vmatprep.subr.bf16.mxu1 %v1714_v6 }
 0x1db   :  { %1351 = vmatpush1.bf16.msra.mxu0 %v434_v19  ;;  %v1657_v19 = vld [vmem:[#allocation8 + $0x60] sm:$0xff] }
 0x1dc   :  { %1352 = vmatprep.subr.bf16.mxu0 %v441_v22  ;;  %1816 = vmatpush1.bf16.msra.mxu1 %v1713_v9  ;;  %v1717_v21 = vunpack.c.l.s8.bf16 %v1657_v19  ;;  %v201_v22 = vld [vmem:[#allocation5 + $0x238] sm:$0xff]  ;;  %v236_v9 = vld [vmem:[#allocation5 + $0x350] sm:$0xff] }
 0x1dd   :  { %1817 = vmatprep.subr.bf16.mxu1 %v1716_v12  ;;  %v513_v32 = vunpack.c.h.s8.bf16 %v201_v22  ;;  %v578_v10 = vunpack.c.l.s8.bf16 %v236_v9  ;;  %v243_v12 = vld [vmem:[#allocation5 + $0x388] sm:$0xff] }
 0x1de   :  { %v591_v14 = vunpack.c.l.s8.bf16 %v243_v12 }
 0x1df   :  { %1353 = vmatpush1.bf16.msra.mxu0 %v440_v25  ;;  %v507_v25 = vunpack.c.l.s8.bf16 %v201_v22 }
 0x1e0   :  { %1354 = vmatprep.subr.bf16.mxu0 %v447_v27  ;;  %1818 = vmatpush1.bf16.msra.mxu1 %v1715_v15  ;;  %v1719_v27 = vunpack.c.h.s8.bf16 %v1657_v19  ;;  %v242_v15 = vld [vmem:[#allocation5 + $0x380] sm:$0xff] }
 0x1e1   :  { %1819 = vmatprep.subr.bf16.mxu1 %v1718_v18  ;;  %v590_v16 = vunpack.c.l.s8.bf16 %v242_v15  ;;  %v249_v18 = vld [vmem:[#allocation5 + $0x3b8] sm:$0xff]  ;;  %v596_v19 = vunpack.c.h.s8.bf16 %v242_v15 }
 0x1e3   :  { %1355 = vmatpush1.bf16.msra.mxu0 %v446_v31  ;;  %v1659_v31 = vld [vmem:[#allocation8 + $0x70] sm:$0xff] }
 0x1e4   :  { %1356 = vmatprep.subr.bf16.mxu0 %v453_v34  ;;  %1820 = vmatpush1.bf16.msra.mxu1 %v1717_v21  ;;  %v1721_v33 = vunpack.c.l.s8.bf16 %v1659_v31  ;;  %v207_v34 = vld [vmem:[#allocation5 + $0x268] sm:$0xff]  ;;  %v248_v21 = vld [vmem:[#allocation5 + $0x3b0] sm:$0xff] }
 0x1e5   :  { %1821 = vmatprep.subr.bf16.mxu1 %v1720_v24  ;;  %v602_v22 = vunpack.c.l.s8.bf16 %v248_v21  ;;  %v255_v24 = vld [vmem:[#allocation5 + $0x3e8] sm:$0xff] }
 0x1e6   :  { %v615_v26 = vunpack.c.l.s8.bf16 %v255_v24 }
 0x1e7   :  { %1357 = vmatpush1.bf16.msra.mxu0 %v452_v37  ;;  %v519_v37 = vunpack.c.l.s8.bf16 %v207_v34 }
 0x1e8   :  { %1358 = vmatprep.subr.bf16.mxu0 %v459_v39  ;;  %1822 = vmatpush1.bf16.msra.mxu1 %v1719_v27  ;;  %v1723_v39 = vunpack.c.h.s8.bf16 %v1659_v31  ;;  %v254_v27 = vld [vmem:[#allocation5 + $0x3e0] sm:$0xff] }
 0x1e9   :  { %1823 = vmatprep.subr.bf16.mxu1 %v1722_v30  ;;  %v614_v28 = vunpack.c.l.s8.bf16 %v254_v27  ;;  %v261_v30 = vld [vmem:[#allocation5 + $0x418] sm:$0xff]  ;;  %v620_v31 = vunpack.c.h.s8.bf16 %v254_v27 }
 0x1eb   :  { %1359 = vmatpush1.bf16.msra.mxu0 %v458_v43  ;;  %v525_v43 = vunpack.c.h.s8.bf16 %v207_v34 }
 0x1ec   :  { %1360 = vmatprep.subr.bf16.mxu0 %v465_v46  ;;  %1824 = vmatpush1.bf16.msra.mxu1 %v1721_v33  ;;  %v531_v46 = vunpack.c.l.s8.bf16 %v213_v44  ;;  %v260_v33 = vld [vmem:[#allocation5 + $0x410] sm:$0xff] }
 0x1ed   :  { %1825 = vmatprep.subr.bf16.mxu1 %v1724_v36  ;;  %v626_v34 = vunpack.c.l.s8.bf16 %v260_v33  ;;  %v267_v36 = vld [vmem:[#allocation5 + $0x448] sm:$0xff] }
 0x1ee   :  { %v639_v38 = vunpack.c.l.s8.bf16 %v267_v36 }
 0x1ef   :  { %1361 = vmatpush1.bf16.msra.mxu0 %v464_v49  ;;  %v537_v49 = vunpack.c.h.s8.bf16 %v213_v44 }
 0x1f0   :  { %1373 = vmatprep.subr.bf16.mxu0 %v471_v51  ;;  %1826 = vmatpush1.bf16.msra.mxu1 %v1723_v39  ;;  %v536_v51 = vunpack.c.h.s8.bf16 %v212_v47  ;;  %v266_v39 = vld [vmem:[#allocation5 + $0x440] sm:$0xff] }
 0x1f1   :  { %1838 = vmatprep.subr.bf16.mxu1 %v1726_v42  ;;  %v645_v42 = vunpack.c.h.s8.bf16 %v267_v36  ;;  %v644_v44 = vunpack.c.h.s8.bf16 %v266_v39 }
 0x1f2   :  { %1363 = vmatmul.mubr.bf16.vlgmr.msra.gmra.mrb[4].mxu0 %v2492_v61  ;;  %v561_v61 = vunpack.c.h.s8.bf16 %v225_v56 }
 0x1f3   :  { %1374 = vmatpush1.bf16.msra.mxu0 %v470_v55  ;;  %1405 = vmatprep.mubr.bf16.mxu0 %v2493_v63  ;;  %v549_v55 = vunpack.c.h.s8.bf16 %v219_v50  ;;  %v560_v63 = vunpack.c.h.s8.bf16 %v224_v59 }
 0x1f4   :  { %1375 = vmatprep.subr.bf16.mxu0 %v477_v58  ;;  %v555_v58 = vunpack.c.l.s8.bf16 %v225_v56  ;;  %v2496_v56 = vld [vmem:[#allocation2 + $0x10] ss:$40 sps:$4 sm:$0xff]  }
 0x1f7   :  { %1376 = vmatpush1.bf16.msra.mxu0 %v476_v62  ;;  %v231_v62 = vld [vmem:[#allocation5 + $0x328] sm:$0xff] }
 0x1f8   :  { %1377 = vmatprep.subr.bf16.mxu0 %v483_v1  ;;  %v567_v0 = vunpack.c.l.s8.bf16 %v231_v62  ;;  %v230_v1 = vld [vmem:[#allocation5 + $0x320] sm:$0xff]  ;;  %v573_v3 = vunpack.c.h.s8.bf16 %v231_v62 }
 0x1f9   :  { %v566_v2 = vunpack.c.l.s8.bf16 %v230_v1  ;;  %v572_v6 = vunpack.c.h.s8.bf16 %v230_v1 }
 0x1fb   :  { %1378 = vmatpush1.bf16.msra.mxu0 %v482_v5  ;;  %v2494_v5 = vld [vmem:[#allocation2 + $0x8] ss:$40 sps:$4 sm:$0xff]  }
 0x1fc   :  { %1379 = vmatprep.subr.bf16.mxu0 %v489_v8  ;;  %v579_v8 = vunpack.c.l.s8.bf16 %v237_v4 }
 0x1ff   :  { %1380 = vmatpush1.bf16.msra.mxu0 %v488_v11  ;;  %v585_v11 = vunpack.c.h.s8.bf16 %v237_v4  ;;  %v290_v4 = vld [vmem:[#allocation5 + $0x500] sm:$0xff] }
 0x200   :  { %1381 = vmatprep.subr.bf16.mxu0 %v495_v13  ;;  %v584_v13 = vunpack.c.h.s8.bf16 %v236_v9 }
 0x203   :  { %1382 = vmatpush1.bf16.msra.mxu0 %v494_v17  ;;  %v597_v17 = vunpack.c.h.s8.bf16 %v243_v12  ;;  %v2838_v12 = vld [vmem:[#allocation7] sm:$0x3f] }
 0x204   :  { %1383 = vmatprep.subr.bf16.mxu0 %v501_v20  ;;  %v603_v20 = vunpack.c.l.s8.bf16 %v249_v18 }
 0x207   :  { %1384 = vmatpush1.bf16.msra.mxu0 %v500_v23  ;;  %v609_v23 = vunpack.c.h.s8.bf16 %v249_v18  ;;  %v692_v18 = vunpack.c.h.s8.bf16 %v290_v4 }
 0x208   :  { %1385 = vmatprep.subr.bf16.mxu0 %v507_v25  ;;  %v608_v25 = vunpack.c.h.s8.bf16 %v248_v21 }
 0x20b   :  { %1386 = vmatpush1.bf16.msra.mxu0 %v506_v29  ;;  %v621_v29 = vunpack.c.h.s8.bf16 %v255_v24 }
 0x20c   :  { %1387 = vmatprep.subr.bf16.mxu0 %v513_v32  ;;  %v627_v32 = vunpack.c.l.s8.bf16 %v261_v30 }
 0x20f   :  { %1388 = vmatpush1.bf16.msra.mxu0 %v512_v35  ;;  %v633_v35 = vunpack.c.h.s8.bf16 %v261_v30 }
 0x210   :  { %1389 = vmatprep.subr.bf16.mxu0 %v519_v37  ;;  %v632_v37 = vunpack.c.h.s8.bf16 %v260_v33 }
 0x213   :  { %1390 = vmatpush1.bf16.msra.mxu0 %v518_v41  ;;  %v638_v41 = vunpack.c.l.s8.bf16 %v266_v39 }
 0x214   :  { %1391 = vmatprep.subr.bf16.mxu0 %v525_v43  ;;  %v273_v43 = vld [vmem:[#allocation5 + $0x478] sm:$0xff] }
 0x217   :  { %1392 = vmatpush1.bf16.msra.mxu0 %v524_v45  ;;  %v651_v45 = vunpack.c.l.s8.bf16 %v273_v43 }
 0x218   :  { %1393 = vmatprep.subr.bf16.mxu0 %v531_v46  ;;  %v272_v46 = vld [vmem:[#allocation5 + $0x470] sm:$0xff] }
 0x219   :  { %v650_v47 = vunpack.c.l.s8.bf16 %v272_v46  ;;  %v656_v50 = vunpack.c.h.s8.bf16 %v272_v46 }
 0x21b   :  { %1394 = vmatpush1.bf16.msra.mxu0 %v530_v48  ;;  %v657_v48 = vunpack.c.h.s8.bf16 %v273_v43 }
 0x21c   :  { %1395 = vmatprep.subr.bf16.mxu0 %v537_v49  ;;  %v279_v49 = vld [vmem:[#allocation5 + $0x4a8] sm:$0xff] }
 0x21f   :  { %1396 = vmatpush1.bf16.msra.mxu0 %v536_v51  ;;  %v663_v51 = vunpack.c.l.s8.bf16 %v279_v49 }
 0x220   :  { %1397 = vmatprep.subr.bf16.mxu0 %v543_v52  ;;  %v278_v52 = vld [vmem:[#allocation5 + $0x4a0] sm:$0xff] }
 0x221   :  { %v662_v53 = vunpack.c.l.s8.bf16 %v278_v52 }
 0x223   :  { %1398 = vmatpush1.bf16.msra.mxu0 %v542_v54  ;;  %v669_v54 = vunpack.c.h.s8.bf16 %v279_v49 }
 0x224   :  { %1399 = vmatprep.subr.bf16.mxu0 %v549_v55  ;;  %v285_v55 = vld [vmem:[#allocation5 + $0x4d8] sm:$0xff] }
 0x225   :  { %v675_v59 = vunpack.c.l.s8.bf16 %v285_v55 }
 0x227   :  { %1400 = vmatpush1.bf16.msra.mxu0 %v548_v57  ;;  %v668_v57 = vunpack.c.h.s8.bf16 %v278_v52 }
 0x228   :  { %1401 = vmatprep.subr.bf16.mxu0 %v555_v58  ;;  %v2497_v58 = vld [vmem:[#allocation2 + $0x1c] ss:$40 sps:$4 sm:$0xff]  }
 0x22b   :  { %1402 = vmatpush1.bf16.msra.mxu0 %v554_v60  ;;  %v284_v60 = vld [vmem:[#allocation5 + $0x4d0] sm:$0xff] }
 0x22c   :  { %1403 = vmatprep.subr.bf16.mxu0 %v561_v61  ;;  %v1547_v61 = vlaneseq  ;;  %v674_v62 = vunpack.c.l.s8.bf16 %v284_v60 }
 0x22e   :  { %v2823_v1 = vshrl.u32 %v1547_v61, 7  ;;  %v302_v61 = vld [vmem:[#allocation5 + $0x560] sm:$0xff] }
 0x22f   :  { %1404 = vmatpush1.bf16.msra.mxu0 %v560_v63  ;;  %v681_v63 = vunpack.c.h.s8.bf16 %v285_v55 }
 0x230   :  { %1416 = vmatprep.subr.bf16.mxu0 %v567_v0  ;;  %v291_v0 = vld [vmem:[#allocation5 + $0x508] sm:$0xff]  ;;  %v2835_v9 = vsub.s32 1, %v2823_v1 }
 0x232   :  { %1406 = vmatmul.mubr.bf16.vlgmr.msra.gmra.mrb[4].mxu0 %v2494_v5  ;;  %v2826_v5 = vsub.s32 0, %v2823_v1 }
 0x233   :  { %1417 = vmatpush1.bf16.msra.mxu0 %v566_v2  ;;  %1448 = vmatprep.mubr.bf16.mxu0 %v2495_v7  ;;  %v680_v2 = vunpack.c.h.s8.bf16 %v284_v60  ;;  %v686_v7 = vunpack.c.l.s8.bf16 %v290_v4  ;;  %v1661_v60 = vld [vmem:[#allocation8 + $0x80] sm:$0xff] }
 0x234   :  { %1418 = vmatprep.subr.bf16.mxu0 %v573_v3  ;;  %v687_v3 = vunpack.c.l.s8.bf16 %v291_v0 }
 0x237   :  { %1419 = vmatpush1.bf16.msra.mxu0 %v572_v6  ;;  %v1557_v6 = vsub.s32 2, %v2823_v1 }
 0x238   :  { %1420 = vmatprep.subr.bf16.mxu0 %v579_v8  ;;  %v2832_v8 = vld [vmem:[%s2895_s2] sm:$0x3f] }
 0x239   :  { %v1558_v15 = vrot.slane %v2832_v8, %v1557_v6 }
 0x23b   :  { %1421 = vmatpush1.bf16.msra.mxu0 %v578_v10  ;;  %v1561_v10 = vsub.s32 3, %v2823_v1 }
 0x23c   :  { %1422 = vmatprep.subr.bf16.mxu0 %v585_v11  ;;  %v693_v11 = vunpack.c.h.s8.bf16 %v291_v0 }
 0x23f   :  { %1423 = vmatpush1.bf16.msra.mxu0 %v584_v13  ;;  %v297_v13 = vld [vmem:[#allocation5 + $0x538] sm:$0xff] }
 0x240   :  { %1424 = vmatprep.subr.bf16.mxu0 %v591_v14  ;;  %v1550_v14 = vrot.slane %v2832_v8, %v2826_v5  ;;  %v699_v21 = vunpack.c.l.s8.bf16 %v297_v13  ;;  %v705_v36 = vunpack.c.h.s8.bf16 %v297_v13 }
 0x243   :  { %1425 = vmatpush1.bf16.msra.mxu0 %v590_v16  ;;  %v1554_v16 = vrot.slane %v2832_v8, %v2835_v9 }
 0x244   :  { %1426 = vmatprep.subr.bf16.mxu0 %v597_v17  ;;  %v1562_v17 = vrot.slane %v2832_v8, %v1561_v10 }
 0x247   :  { %1427 = vmatpush1.bf16.msra.mxu0 %v596_v19  ;;  %v1594_v19 = vrot.slane %v2838_v12, %v2826_v5 }
 0x248   :  { %1428 = vmatprep.subr.bf16.mxu0 %v603_v20  ;;  %v1602_v20 = vrot.slane %v2838_v12, %v1557_v6  ;;  %v1725_v6 = vunpack.c.l.s8.bf16 %v1661_v60 }
 0x24b   :  { %1429 = vmatpush1.bf16.msra.mxu0 %v602_v22  ;;  %v296_v22 = vld [vmem:[#allocation5 + $0x530] sm:$0xff] }
 0x24c   :  { %1430 = vmatprep.subr.bf16.mxu0 %v609_v23  ;;  %v704_v55 = vunpack.c.h.s8.bf16 %v296_v22 }
 0x24f   :  { %1431 = vmatpush1.bf16.msra.mxu0 %v608_v25  ;;  %v1598_v25 = vrot.slane %v2838_v12, %v2835_v9 }
 0x250   :  { %1432 = vmatprep.subr.bf16.mxu0 %v615_v26  ;;  %v1606_v26 = vrot.slane %v2838_v12, %v1561_v10 }
 0x253   :  { %1433 = vmatpush1.bf16.msra.mxu0 %v614_v28 }
 0x254   :  { %1434 = vmatprep.subr.bf16.mxu0 %v621_v29 }
 0x257   :  { %1435 = vmatpush1.bf16.msra.mxu0 %v620_v31 }
 0x258   :  { %1436 = vmatprep.subr.bf16.mxu0 %v627_v32 }
 0x25b   :  { %1437 = vmatpush1.bf16.msra.mxu0 %v626_v34 }
 0x25c   :  { %1438 = vmatprep.subr.bf16.mxu0 %v633_v35  ;;  %v698_v35 = vunpack.c.l.s8.bf16 %v296_v22 }
 0x25f   :  { %1439 = vmatpush1.bf16.msra.mxu0 %v632_v37 }
 0x260   :  { %1440 = vmatprep.subr.bf16.mxu0 %v639_v38 }
 0x263   :  { %1441 = vmatpush1.bf16.msra.mxu0 %v638_v41 }
 0x264   :  { %1442 = vmatprep.subr.bf16.mxu0 %v645_v42 }
 0x267   :  { %1443 = vmatpush1.bf16.msra.mxu0 %v644_v44 }
 0x268   :  { %1444 = vmatprep.subr.bf16.mxu0 %v651_v45 }
 0x26b   :  { %1445 = vmatpush1.bf16.msra.mxu0 %v650_v47 }
 0x26c   :  { %1446 = vmatprep.subr.bf16.mxu0 %v657_v48  ;;  %v303_v48 = vld [vmem:[#allocation5 + $0x568] sm:$0xff] }
 0x26d   :  { %v717_v13 = vunpack.c.h.s8.bf16 %v303_v48 }
 0x26f   :  { %1447 = vmatpush1.bf16.msra.mxu0 %v656_v50 }
 0x270   :  { %1459 = vmatprep.subr.bf16.mxu0 %v663_v51 }
 0x272   :  { %1449 = vmatmul.mubr.bf16.vlgmr.msra.gmra.mrb[4].mxu0 %v2496_v56 }
 0x273   :  { %1460 = vmatpush1.bf16.msra.mxu0 %v662_v53  ;;  %1491 = vmatprep.mubr.bf16.mxu0 %v2497_v58 }
 0x274   :  { %1461 = vmatprep.subr.bf16.mxu0 %v669_v54 }
 0x277   :  { %1462 = vmatpush1.bf16.msra.mxu0 %v668_v57 }
 0x278   :  { %1463 = vmatprep.subr.bf16.mxu0 %v675_v59  ;;  %v711_v59 = vunpack.c.l.s8.bf16 %v303_v48 }
 0x27b   :  { %1464 = vmatpush1.bf16.msra.mxu0 %v674_v62 }
 0x27c   :  { %1465 = vmatprep.subr.bf16.mxu0 %v681_v63 }
 0x27f   :  { %1466 = vmatpush1.bf16.msra.mxu0 %v680_v2 }
 0x280   :  { %1467 = vmatprep.subr.bf16.mxu0 %v687_v3 }
 0x283   :  { %1468 = vmatpush1.bf16.msra.mxu0 %v686_v7  ;;  %v710_v7 = vunpack.c.l.s8.bf16 %v302_v61 }
 0x284   :  { %1469 = vmatprep.subr.bf16.mxu0 %v693_v11  ;;  %v1728_v11 = vunpack.c.h.s8.bf16 %v2820_v40 }
 0x285   :  { %v1106_v23 = vpop.f32.mrb[0].mxu0  ;;  %v1321_v24 = vpop.f32.mrb[0].mxu1 }
 0x286   :  { %v1577_v27 = vmul.f32 %v1550_v14, %v1106_v23  ;;  %v1579_v28 = vmul.f32 %v1558_v15, %v1321_v24  ;;  %v1108_v29 = vpop.f32.mrb[1].mxu0  ;;  %v1323_v30 = vpop.f32.mrb[1].mxu1 }
 0x287   :  { %v1578_v31 = vmul.f32 %v1554_v16, %v1108_v29  ;;  %v1580_v32 = vmul.f32 %v1562_v17, %v1323_v30  ;;  %v1110_v33 = vpop.f32.mrb[2].mxu0  ;;  %v1325_v34 = vpop.f32.mrb[2].mxu1  ;;  %1470 = vmatpush1.bf16.msra.mxu0 %v692_v18 }
 0x288   :  { %v1621_v37 = vadd.f32 %v1594_v19, %v1577_v27  ;;  %v1623_v38 = vadd.f32 %v1602_v20, %v1579_v28  ;;  %v1583_v39 = vmul.f32 %v1550_v14, %v1110_v33  ;;  %v1585_v41 = vmul.f32 %v1558_v15, %v1325_v34  ;;  %v1112_v42 = vpop.f32.mrb[3].mxu0  ;;  %v1327_v43 = vpop.f32.mrb[3].mxu1  ;;  %1471 = vmatprep.subr.bf16.mxu0 %v699_v21  ;;  %v1664_v14 = vld [vmem:[#allocation8 + $0x98] sm:$0xff]  ;;  %v308_v21 = vld [vmem:[#allocation5 + $0x590] sm:$0xff] }
 0x289   :  { %v1622_v44 = vadd.f32 %v1598_v25, %v1578_v31  ;;  %v1624_v45 = vadd.f32 %v1606_v26, %v1580_v32  ;;  %v1584_v46 = vmul.f32 %v1554_v16, %v1112_v42  ;;  %v1586_v47 = vmul.f32 %v1562_v17, %v1327_v43  ;;  %v309_v15 = vld [vmem:[#allocation5 + $0x598] sm:$0xff]  ;;  %v1665_v31 = vld [vmem:[#allocation8 + $0xa0] sm:$0xff] }
 0x28a   :  { %v1635_v49 = vmax.f32 %v1623_v38, 0.0  ;;  %v1627_v50 = vadd.f32 %v1594_v19, %v1583_v39  ;;  %v1629_v51 = vadd.f32 %v1602_v20, %v1585_v41  ;;  %v1633_v56 = vmax.f32 %v1621_v37, 0.0  ;;  %v1663_v20 = vld [vmem:[#allocation8 + $0x90] sm:$0xff]  ;;  %v314_v32 = vld [vmem:[#allocation5 + $0x5c0] sm:$0xff] }
 0x28b   :  { %v1636_v52 = vmax.f32 %v1624_v45, 0.0  ;;  %v1628_v53 = vadd.f32 %v1598_v25, %v1584_v46  ;;  %v1630_v54 = vadd.f32 %v1606_v26, %v1586_v47  ;;  %1472 = vmatpush1.bf16.msra.mxu0 %v698_v35  ;;  %v1634_v62 = vmax.f32 %v1622_v44, 0.0  ;;  %v1666_v25 = vld [vmem:[#allocation8 + $0xa8] sm:$0xff]  ;;  %v1668_v37 = vld [vmem:[#allocation8 + $0xb8] sm:$0xff]  ;;  %v1667_v44 = vld [vmem:[#allocation8 + $0xb0] sm:$0xff] }
 0x28c   :  { %v1639_v57 = vmax.f32 %v1627_v50, 0.0  ;;  %v1641_v58 = vmax.f32 %v1629_v51, 0.0  ;;  %1473 = vmatprep.subr.bf16.mxu0 %v705_v36  ;;  %v1727_v16 = vunpack.c.h.s8.bf16 %v1661_v60  ;;  %v716_v17 = vunpack.c.h.s8.bf16 %v302_v61  ;;  %v315_v26 = vld [vmem:[#allocation5 + $0x5c8] sm:$0xff]  ;;  %v321_v38 = vld [vmem:[#allocation5 + $0x5f8] sm:$0xff]  ;;  %v320_v45 = vld [vmem:[#allocation5 + $0x5f0] sm:$0xff] }
 0x28d   :  { %v1640_v63 = vmax.f32 %v1628_v53, 0.0  ;;  %v1642_v0 = vmax.f32 %v1630_v54, 0.0  ;;  %v1730_v18 = vunpack.c.l.s8.bf16 %v1664_v14  ;;  %v723_v19 = vunpack.c.l.s8.bf16 %v309_v15  ;;  %v1670_v50 = vld [vmem:[#allocation8 + $0xc8] sm:$0xff] }
 0x28e   :  { %v1789_v2 = vpack.c.bf16 %v1639_v57, %v1633_v56  ;;  %v2852_v3 = vpack.c.bf16 %v1641_v58, %v1635_v49  ;;  %v1729_v22 = vunpack.c.l.s8.bf16 %v1663_v20  ;;  %v722_v40 = vunpack.c.l.s8.bf16 %v308_v21  ;;  %v327_v51 = vld [vmem:[#allocation5 + $0x628] sm:$0xff]  ;;  %v326_v57 = vld [vmem:[#allocation5 + $0x620] sm:$0xff] }
 0x28f   :  { %1474 = vmatpush1.bf16.msra.mxu0 %v704_v55  ;;  %v1790_v4 = vpack.c.bf16 %v1640_v63, %v1634_v62  ;;  %v1792_v10 = vpack.c.bf16 %v1642_v0, %v1636_v52  ;;  %v1732_v23 = vunpack.c.h.s8.bf16 %v1664_v14  ;;  %v729_v24 = vunpack.c.h.s8.bf16 %v309_v15  ;;  %v1669_v56 = vld [vmem:[#allocation8 + $0xc0] sm:$0xff]  ;;  %v1672_v62 = vld [vmem:[#allocation8 + $0xd8] sm:$0xff] }
 0x290   :  { %1475 = vmatprep.subr.bf16.mxu0 %v711_v59  ;;  %v1731_v27 = vunpack.c.h.s8.bf16 %v1663_v20  ;;  %v728_v28 = vunpack.c.h.s8.bf16 %v308_v21  ;;  %v1734_v29 = vunpack.c.l.s8.bf16 %v1666_v25  ;;  %v735_v30 = vunpack.c.l.s8.bf16 %v315_v26  ;;  %v333_v63 = vld [vmem:[#allocation5 + $0x658] sm:$0xff]  ;;  %v2498_v0 = vld [vmem:[#allocation2 + $0x18] ss:$40 sps:$4 sm:$0xff]  }
 0x291   :  { %1827 = vmatprep.mubr.bf16.mxu1 %v1790_v4  ;;  %v1733_v33 = vunpack.c.l.s8.bf16 %v1665_v31  ;;  %v734_v34 = vunpack.c.l.s8.bf16 %v314_v32  ;;  %v1736_v35 = vunpack.c.h.s8.bf16 %v1666_v25  ;;  %v741_v36 = vunpack.c.h.s8.bf16 %v315_v26 }
 0x292   :  { %1828 = vmatmul.mubr.bf16.vlgmr.msra.gmra.mrb[4].mxu1 %v1789_v2  ;;  %v1735_v39 = vunpack.c.h.s8.bf16 %v1665_v31  ;;  %v740_v41 = vunpack.c.h.s8.bf16 %v314_v32  ;;  %v1738_v42 = vunpack.c.l.s8.bf16 %v1668_v37  ;;  %v747_v43 = vunpack.c.l.s8.bf16 %v321_v38 }
 0x293   :  { %1839 = vmatpush1.bf16.msra.mxu1 %v1725_v6  ;;  %1476 = vmatpush1.bf16.msra.mxu0 %v710_v7  ;;  %v1737_v46 = vunpack.c.l.s8.bf16 %v1667_v44  ;;  %v746_v47 = vunpack.c.l.s8.bf16 %v320_v45  ;;  %v1740_v48 = vunpack.c.h.s8.bf16 %v1668_v37  ;;  %v753_v49 = vunpack.c.h.s8.bf16 %v321_v38 }
 0x294   :  { %1870 = vmatprep.mubr.bf16.mxu1 %v1792_v10  ;;  %1840 = vmatprep.subr.bf16.mxu1 %v1728_v11  ;;  %v1739_v52 = vunpack.c.h.s8.bf16 %v1667_v44  ;;  %v752_v53 = vunpack.c.h.s8.bf16 %v320_v45  ;;  %v1742_v54 = vunpack.c.l.s8.bf16 %v1670_v50  ;;  %v759_v55 = vunpack.c.l.s8.bf16 %v327_v51  ;;  %v1671_v10 = vld [vmem:[#allocation8 + $0xd0] sm:$0xff] }
 0x295   :  { %1477 = vmatprep.subr.bf16.mxu0 %v717_v13  ;;  %v1741_v58 = vunpack.c.l.s8.bf16 %v1669_v56  ;;  %v758_v59 = vunpack.c.l.s8.bf16 %v326_v57  ;;  %v1744_v60 = vunpack.c.h.s8.bf16 %v1670_v50  ;;  %v765_v61 = vunpack.c.h.s8.bf16 %v327_v51  ;;  %v332_v11 = vld [vmem:[#allocation5 + $0x650] sm:$0xff] }
 0x296   :  { %v1743_v2 = vunpack.c.h.s8.bf16 %v1669_v56  ;;  %v764_v4 = vunpack.c.h.s8.bf16 %v326_v57  ;;  %v1746_v6 = vunpack.c.l.s8.bf16 %v1672_v62  ;;  %v771_v7 = vunpack.c.l.s8.bf16 %v333_v63  ;;  %v2499_v13 = vld [vmem:[#allocation2 + $0x24] ss:$40 sps:$4 sm:$0xff]  }
 0x297   :  { %1841 = vmatpush1.bf16.msra.mxu1 %v1727_v16  ;;  %1478 = vmatpush1.bf16.msra.mxu0 %v716_v17  ;;  %v1745_v14 = vunpack.c.l.s8.bf16 %v1671_v10  ;;  %v770_v15 = vunpack.c.l.s8.bf16 %v332_v11  ;;  %v1748_v16 = vunpack.c.h.s8.bf16 %v1672_v62  ;;  %v777_v17 = vunpack.c.h.s8.bf16 %v333_v63 }
 0x298   :  { %1842 = vmatprep.subr.bf16.mxu1 %v1730_v18  ;;  %1479 = vmatprep.subr.bf16.mxu0 %v723_v19  ;;  %v1674_v18 = vld [vmem:[#allocation8 + $0xe8] sm:$0xff]  ;;  %v1747_v20 = vunpack.c.h.s8.bf16 %v1671_v10  ;;  %v776_v21 = vunpack.c.h.s8.bf16 %v332_v11  ;;  %v362_v11 = vld [vmem:[#allocation5 + $0x740] sm:$0xff] }
 0x299   :  { %v339_v19 = vld [vmem:[#allocation5 + $0x688] sm:$0xff] }
 0x29b   :  { %1843 = vmatpush1.bf16.msra.mxu1 %v1729_v22  ;;  %1480 = vmatpush1.bf16.msra.mxu0 %v722_v40  ;;  %v1750_v22 = vunpack.c.l.s8.bf16 %v1674_v18  ;;  %v783_v40 = vunpack.c.l.s8.bf16 %v339_v19 }
 0x29c   :  { %1844 = vmatprep.subr.bf16.mxu1 %v1732_v23  ;;  %1481 = vmatprep.subr.bf16.mxu0 %v729_v24  ;;  %v1673_v23 = vld [vmem:[#allocation8 + $0xe0] sm:$0xff] }
 0x29d   :  { %v338_v24 = vld [vmem:[#allocation5 + $0x680] sm:$0xff]  ;;  %v1749_v25 = vunpack.c.l.s8.bf16 %v1673_v23  ;;  %v1751_v31 = vunpack.c.h.s8.bf16 %v1673_v23  ;;  %v368_v23 = vld [vmem:[#allocation5 + $0x770] sm:$0xff] }
 0x29e   :  { %v782_v26 = vunpack.c.l.s8.bf16 %v338_v24  ;;  %v788_v32 = vunpack.c.h.s8.bf16 %v338_v24 }
 0x29f   :  { %1845 = vmatpush1.bf16.msra.mxu1 %v1731_v27  ;;  %1482 = vmatpush1.bf16.msra.mxu0 %v728_v28  ;;  %v1752_v27 = vunpack.c.h.s8.bf16 %v1674_v18  ;;  %v789_v28 = vunpack.c.h.s8.bf16 %v339_v19  ;;  %v369_v19 = vld [vmem:[#allocation5 + $0x778] sm:$0xff] }
 0x2a0   :  { %1846 = vmatprep.subr.bf16.mxu1 %v1734_v29  ;;  %1483 = vmatprep.subr.bf16.mxu0 %v735_v30  ;;  %v1676_v29 = vld [vmem:[#allocation8 + $0xf8] sm:$0xff] }
 0x2a1   :  { %v345_v30 = vld [vmem:[#allocation5 + $0x6b8] sm:$0xff] }
 0x2a3   :  { %1847 = vmatpush1.bf16.msra.mxu1 %v1733_v33  ;;  %1484 = vmatpush1.bf16.msra.mxu0 %v734_v34  ;;  %v1754_v33 = vunpack.c.l.s8.bf16 %v1676_v29  ;;  %v795_v34 = vunpack.c.l.s8.bf16 %v345_v30 }
 0x2a4   :  { %1848 = vmatprep.subr.bf16.mxu1 %v1736_v35  ;;  %1485 = vmatprep.subr.bf16.mxu0 %v741_v36  ;;  %v1675_v35 = vld [vmem:[#allocation8 + $0xf0] sm:$0xff] }
 0x2a5   :  { %v344_v36 = vld [vmem:[#allocation5 + $0x6b0] sm:$0xff]  ;;  %v1753_v37 = vunpack.c.l.s8.bf16 %v1675_v35  ;;  %v1755_v44 = vunpack.c.h.s8.bf16 %v1675_v35 }
 0x2a6   :  { %v794_v38 = vunpack.c.l.s8.bf16 %v344_v36  ;;  %v800_v45 = vunpack.c.h.s8.bf16 %v344_v36 }
 0x2a7   :  { %1849 = vmatpush1.bf16.msra.mxu1 %v1735_v39  ;;  %1486 = vmatpush1.bf16.msra.mxu0 %v740_v41  ;;  %v1756_v39 = vunpack.c.h.s8.bf16 %v1676_v29  ;;  %v801_v41 = vunpack.c.h.s8.bf16 %v345_v30  ;;  %v1686_v30 = vld [vmem:[#allocation8 + $0x148] sm:$0xff] }
 0x2a8   :  { %1850 = vmatprep.subr.bf16.mxu1 %v1738_v42  ;;  %1487 = vmatprep.subr.bf16.mxu0 %v747_v43  ;;  %v351_v42 = vld [vmem:[#allocation5 + $0x6e8] sm:$0xff]  ;;  %v1776_v36 = vunpack.c.h.s8.bf16 %v1686_v30 }
 0x2a9   :  { %v1678_v43 = vld [vmem:[#allocation8 + $0x108] sm:$0xff] }
 0x2ab   :  { %1851 = vmatpush1.bf16.msra.mxu1 %v1737_v46  ;;  %1488 = vmatpush1.bf16.msra.mxu0 %v746_v47  ;;  %v807_v46 = vunpack.c.l.s8.bf16 %v351_v42  ;;  %v350_v47 = vld [vmem:[#allocation5 + $0x6e0] sm:$0xff] }
 0x2ac   :  { %1852 = vmatprep.subr.bf16.mxu1 %v1740_v48  ;;  %1489 = vmatprep.subr.bf16.mxu0 %v753_v49  ;;  %v1758_v48 = vunpack.c.l.s8.bf16 %v1678_v43  ;;  %v1677_v49 = vld [vmem:[#allocation8 + $0x100] sm:$0xff]  ;;  %v806_v50 = vunpack.c.l.s8.bf16 %v350_v47  ;;  %v812_v56 = vunpack.c.h.s8.bf16 %v350_v47 }
 0x2ad   :  { %v1757_v51 = vunpack.c.l.s8.bf16 %v1677_v49  ;;  %v1759_v57 = vunpack.c.h.s8.bf16 %v1677_v49 }
 0x2af   :  { %1853 = vmatpush1.bf16.msra.mxu1 %v1739_v52  ;;  %1490 = vmatpush1.bf16.msra.mxu0 %v752_v53  ;;  %v813_v52 = vunpack.c.h.s8.bf16 %v351_v42  ;;  %v1760_v53 = vunpack.c.h.s8.bf16 %v1678_v43  ;;  %v1687_v42 = vld [vmem:[#allocation8 + $0x150] sm:$0xff] }
 0x2b0   :  { %1854 = vmatprep.subr.bf16.mxu1 %v1742_v54  ;;  %1502 = vmatprep.subr.bf16.mxu0 %v759_v55  ;;  %v357_v54 = vld [vmem:[#allocation5 + $0x718] sm:$0xff]  ;;  %v1777_v43 = vunpack.c.l.s8.bf16 %v1687_v42 }
 0x2b1   :  { %v1680_v55 = vld [vmem:[#allocation8 + $0x118] sm:$0xff] }
 0x2b2   :  { %1492 = vmatmul.mubr.bf16.vlgmr.msra.gmra.mrb[4].mxu0 %v2498_v0  ;;  %v825_v0 = vunpack.c.h.s8.bf16 %v357_v54 }
 0x2b3   :  { %1855 = vmatpush1.bf16.msra.mxu1 %v1741_v58  ;;  %1503 = vmatpush1.bf16.msra.mxu0 %v758_v59  ;;  %v819_v58 = vunpack.c.l.s8.bf16 %v357_v54  ;;  %v356_v59 = vld [vmem:[#allocation5 + $0x710] sm:$0xff] }
 0x2b4   :  { %1856 = vmatprep.subr.bf16.mxu1 %v1744_v60  ;;  %1504 = vmatprep.subr.bf16.mxu0 %v765_v61  ;;  %v1762_v60 = vunpack.c.l.s8.bf16 %v1680_v55  ;;  %v1679_v61 = vld [vmem:[#allocation8 + $0x110] sm:$0xff]  ;;  %v818_v62 = vunpack.c.l.s8.bf16 %v356_v59 }
 0x2b5   :  { %1534 = vmatprep.mubr.bf16.mxu0 %v2499_v13  ;;  %v1761_v63 = vunpack.c.l.s8.bf16 %v1679_v61  ;;  %v1691_v54 = vld [vmem:[#allocation8 + $0x170] sm:$0xff] }
 0x2b7   :  { %1857 = vmatpush1.bf16.msra.mxu1 %v1743_v2  ;;  %1505 = vmatpush1.bf16.msra.mxu0 %v764_v4  ;;  %v1764_v2 = vunpack.c.h.s8.bf16 %v1680_v55  ;;  %v363_v4 = vld [vmem:[#allocation5 + $0x748] sm:$0xff]  ;;  %v1785_v55 = vunpack.c.l.s8.bf16 %v1691_v54 }
 0x2b8   :  { %1858 = vmatprep.subr.bf16.mxu1 %v1746_v6  ;;  %1506 = vmatprep.subr.bf16.mxu0 %v771_v7  ;;  %v824_v6 = vunpack.c.h.s8.bf16 %v356_v59  ;;  %v1763_v7 = vunpack.c.h.s8.bf16 %v1679_v61  ;;  %v831_v10 = vunpack.c.l.s8.bf16 %v363_v4  ;;  %v1565_v59 = vsub.s32 4, %v2823_v1 }
 0x2ba   :  { %v1566_v61 = vrot.slane %v2832_v8, %v1565_v59 }
 0x2bb   :  { %1859 = vmatpush1.bf16.msra.mxu1 %v1745_v14  ;;  %1507 = vmatpush1.bf16.msra.mxu0 %v770_v15  ;;  %v1681_v14 = vld [vmem:[#allocation8 + $0x120] sm:$0xff]  ;;  %v830_v15 = vunpack.c.l.s8.bf16 %v362_v11 }
 0x2bc   :  { %1860 = vmatprep.subr.bf16.mxu1 %v1748_v16  ;;  %1508 = vmatprep.subr.bf16.mxu0 %v777_v17  ;;  %v1765_v16 = vunpack.c.l.s8.bf16 %v1681_v14  ;;  %v837_v17 = vunpack.c.h.s8.bf16 %v363_v4 }
 0x2bf   :  { %1861 = vmatpush1.bf16.msra.mxu1 %v1747_v20  ;;  %1509 = vmatpush1.bf16.msra.mxu0 %v776_v21  ;;  %v1684_v20 = vld [vmem:[#allocation8 + $0x138] sm:$0xff]  ;;  %v836_v21 = vunpack.c.h.s8.bf16 %v362_v11 }
 0x2c0   :  { %1862 = vmatprep.subr.bf16.mxu1 %v1750_v22  ;;  %1510 = vmatprep.subr.bf16.mxu0 %v783_v40  ;;  %v1767_v22 = vunpack.c.h.s8.bf16 %v1681_v14  ;;  %v843_v40 = vunpack.c.l.s8.bf16 %v369_v19  ;;  %v1770_v24 = vunpack.c.l.s8.bf16 %v1684_v20  ;;  %v1772_v29 = vunpack.c.h.s8.bf16 %v1684_v20 }
 0x2c3   :  { %1863 = vmatpush1.bf16.msra.mxu1 %v1749_v25  ;;  %1511 = vmatpush1.bf16.msra.mxu0 %v782_v26  ;;  %v1683_v25 = vld [vmem:[#allocation8 + $0x130] sm:$0xff]  ;;  %v842_v26 = vunpack.c.l.s8.bf16 %v368_v23 }
 0x2c4   :  { %1864 = vmatprep.subr.bf16.mxu1 %v1752_v27  ;;  %1512 = vmatprep.subr.bf16.mxu0 %v789_v28  ;;  %v1769_v27 = vunpack.c.l.s8.bf16 %v1683_v25  ;;  %v849_v28 = vunpack.c.h.s8.bf16 %v369_v19 }
 0x2c7   :  { %1865 = vmatpush1.bf16.msra.mxu1 %v1751_v31  ;;  %1513 = vmatpush1.bf16.msra.mxu0 %v788_v32  ;;  %v848_v31 = vunpack.c.h.s8.bf16 %v368_v23  ;;  %v1771_v32 = vunpack.c.h.s8.bf16 %v1683_v25  ;;  %v2471_v23 = vld [vmem:[#allocation10 + $0x50] sm:$0xff]   ;;  %v2473_v25 = vld [vmem:[#allocation10 + $0x58] sm:$0xff]  }
 0x2c8   :  { %1866 = vmatprep.subr.bf16.mxu1 %v1754_v33  ;;  %1514 = vmatprep.subr.bf16.mxu0 %v795_v34  ;;  %v1774_v33 = vunpack.c.l.s8.bf16 %v1686_v30  ;;  %v1685_v34 = vld [vmem:[#allocation8 + $0x140] sm:$0xff]  ;;  %v2478_v30 = vld [vmem:[#allocation10 + $0x28] sm:$0xff]  }
 0x2c9   :  { %v1773_v35 = vunpack.c.l.s8.bf16 %v1685_v34 }
 0x2cb   :  { %1867 = vmatpush1.bf16.msra.mxu1 %v1753_v37  ;;  %1515 = vmatpush1.bf16.msra.mxu0 %v794_v38  ;;  %v1688_v37 = vld [vmem:[#allocation8 + $0x158] sm:$0xff]  ;;  %v2500_v38 = vld [vmem:[#allocation2 + $0x20] ss:$40 sps:$4 sm:$0xff]  }
 0x2cc   :  { %1868 = vmatprep.subr.bf16.mxu1 %v1756_v39  ;;  %1516 = vmatprep.subr.bf16.mxu0 %v801_v41  ;;  %v1775_v39 = vunpack.c.h.s8.bf16 %v1685_v34  ;;  %v1778_v41 = vunpack.c.l.s8.bf16 %v1688_v37  ;;  %v2482_v34 = vld [vmem:[#allocation10 + $0x38] sm:$0xff]  }
 0x2cf   :  { %1869 = vmatpush1.bf16.msra.mxu1 %v1755_v44  ;;  %1517 = vmatpush1.bf16.msra.mxu0 %v800_v45  ;;  %v1780_v44 = vunpack.c.h.s8.bf16 %v1688_v37  ;;  %v1690_v45 = vld [vmem:[#allocation8 + $0x168] sm:$0xff] }
 0x2d0   :  { %1518 = vmatprep.subr.bf16.mxu0 %v807_v46  ;;  %1881 = vmatprep.subr.bf16.mxu1 %v1758_v48  ;;  %v1779_v46 = vunpack.c.h.s8.bf16 %v1687_v42  ;;  %v1782_v47 = vunpack.c.l.s8.bf16 %v1690_v45  ;;  %v1689_v48 = vld [vmem:[#allocation8 + $0x160] sm:$0xff]  ;;  %v1940_v37 = vld [vmem:[%s2899_s6] sm:$0x3] }
 0x2d1   :  { %v1781_v49 = vunpack.c.l.s8.bf16 %v1689_v48 }
 0x2d2   :  { %1871 = vmatmul.mubr.bf16.vlgmr.msra.gmra.mrb[4].mxu1 %v2852_v3  ;;  %v1682_v3 = vld [vmem:[#allocation8 + $0x128] sm:$0xff] }
 0x2d3   :  { %1519 = vmatpush1.bf16.msra.mxu0 %v806_v50  ;;  %1882 = vmatpush1.bf16.msra.mxu1 %v1757_v51  ;;  %v1766_v13 = vunpack.c.l.s8.bf16 %v1682_v3  ;;  %v1768_v18 = vunpack.c.h.s8.bf16 %v1682_v3  ;;  %v1784_v50 = vunpack.c.h.s8.bf16 %v1690_v45  ;;  %v1783_v51 = vunpack.c.h.s8.bf16 %v1689_v48 }
 0x2d4   :  { %1520 = vmatprep.subr.bf16.mxu0 %v813_v52  ;;  %1883 = vmatprep.subr.bf16.mxu1 %v1760_v53  ;;  %v1692_v52 = vld [vmem:[#allocation8 + $0x178] sm:$0xff] }
 0x2d5   :  { %v1786_v53 = vunpack.c.l.s8.bf16 %v1692_v52 }
 0x2d7   :  { %1521 = vmatpush1.bf16.msra.mxu0 %v812_v56  ;;  %1884 = vmatpush1.bf16.msra.mxu1 %v1759_v57  ;;  %v1788_v56 = vunpack.c.h.s8.bf16 %v1692_v52  ;;  %v1787_v57 = vunpack.c.h.s8.bf16 %v1691_v54 }
 0x2d8   :  { %1522 = vmatprep.subr.bf16.mxu0 %v819_v58  ;;  %1885 = vmatprep.subr.bf16.mxu1 %v1762_v60  ;;  %v2467_v58 = vld [vmem:[#allocation10 + $0x40] sm:$0xff]   ;;  %v1569_v60 = vsub.s32 5, %v2823_v1 }
 0x2db   :  { %1523 = vmatpush1.bf16.msra.mxu0 %v818_v62  ;;  %1886 = vmatpush1.bf16.msra.mxu1 %v1761_v63  ;;  %v1570_v62 = vrot.slane %v2832_v8, %v1569_v60  ;;  %v1610_v63 = vrot.slane %v2838_v12, %v1565_v59 }
 0x2dc   :  { %1524 = vmatprep.subr.bf16.mxu0 %v825_v0  ;;  %1887 = vmatprep.subr.bf16.mxu1 %v1764_v2  ;;  %v1614_v2 = vrot.slane %v2838_v12, %v1569_v60  ;;  %v2470_v12 = vld [vmem:[#allocation10 + $0x8] sm:$0xff]   ;;  %v2483_v60 = vld [vmem:[#allocation11] sm:$0xff]  }
 0x2df   :  { %1525 = vmatpush1.bf16.msra.mxu0 %v824_v6  ;;  %1888 = vmatpush1.bf16.msra.mxu1 %v1763_v7 }
 0x2e0   :  { %1526 = vmatprep.subr.bf16.mxu0 %v831_v10  ;;  %1889 = vmatprep.subr.bf16.mxu1 %v1766_v13 }
 0x2e3   :  { %1527 = vmatpush1.bf16.msra.mxu0 %v830_v15  ;;  %1890 = vmatpush1.bf16.msra.mxu1 %v1765_v16 }
 0x2e4   :  { %1528 = vmatprep.subr.bf16.mxu0 %v837_v17  ;;  %1891 = vmatprep.subr.bf16.mxu1 %v1768_v18 }
 0x2e7   :  { %1529 = vmatpush1.bf16.msra.mxu0 %v836_v21  ;;  %1892 = vmatpush1.bf16.msra.mxu1 %v1767_v22  ;;  %v2468_v22 = vld [vmem:[#allocation10] sm:$0xff]  }
 0x2e8   :  { %1530 = vmatprep.subr.bf16.mxu0 %v843_v40  ;;  %1893 = vmatprep.subr.bf16.mxu1 %v1770_v24  ;;  %v2469_v40 = vld [vmem:[#allocation10 + $0x48] sm:$0xff]   ;;  %v2472_v24 = vld [vmem:[#allocation10 + $0x10] sm:$0xff]  }
 0x2eb   :  { %1531 = vmatpush1.bf16.msra.mxu0 %v842_v26  ;;  %1894 = vmatpush1.bf16.msra.mxu1 %v1769_v27  ;;  %v2474_v26 = vld [vmem:[#allocation10 + $0x18] sm:$0xff]   ;;  %v2475_v27 = vld [vmem:[#allocation10 + $0x60] sm:$0xff]  }
 0x2ec   :  { %1532 = vmatprep.subr.bf16.mxu0 %v849_v28  ;;  %1895 = vmatprep.subr.bf16.mxu1 %v1772_v29  ;;  %v2476_v28 = vld [vmem:[#allocation10 + $0x20] sm:$0xff]   ;;  %v2477_v29 = vld [vmem:[#allocation10 + $0x68] sm:$0xff]  }
 0x2ef   :  { %1533 = vmatpush1.bf16.msra.mxu0 %v848_v31  ;;  %1896 = vmatpush1.bf16.msra.mxu1 %v1771_v32  ;;  %v2479_v31 = vld [vmem:[#allocation10 + $0x70] sm:$0xff]  }
 0x2f0   :  { %1897 = vmatprep.subr.bf16.mxu1 %v1774_v33  ;;  %v2480_v32 = vld [vmem:[#allocation10 + $0x30] sm:$0xff]   ;;  %v2481_v33 = vld [vmem:[#allocation10 + $0x78] sm:$0xff]  }
 0x2f2   :  { %1535 = vmatmul.mubr.bf16.vlgmr.msra.gmra.mrb[4].mxu0 %v2500_v38 }
 0x2f3   :  { %1898 = vmatpush1.bf16.msra.mxu1 %v1773_v35  ;;  %v2679_v35 = vmov 0.0  }
 0x2f4   :  { %1899 = vmatprep.subr.bf16.mxu1 %v1776_v36  ;;  %v1924_v36 = vld [vmem:[%s2898_s5] sm:$0x3] }
 0x2f5   :  { %v1929_v38 = vrot.slane %v1924_v36, %v2826_v5 }
 0x2f7   :  { %1900 = vmatpush1.bf16.msra.mxu1 %v1775_v39  ;;  %v1933_v39 = vrot.slane %v1924_v36, %v2835_v9 }
 0x2f8   :  { %1901 = vmatprep.subr.bf16.mxu1 %v1778_v41  ;;  %v1945_v41 = vrot.slane %v1940_v37, %v2826_v5 }
 0x2fb   :  { %1902 = vmatpush1.bf16.msra.mxu1 %v1777_v43  ;;  %v1949_v43 = vrot.slane %v1940_v37, %v2835_v9  ;;  %v2484_v9 = vld [vmem:[#allocation11 + $0x8] sm:$0xff]  }
 0x2fc   :  { %1903 = vmatprep.subr.bf16.mxu1 %v1780_v44 }
 0x2ff   :  { %1904 = vmatpush1.bf16.msra.mxu1 %v1779_v46 }
 0x300   :  { %1905 = vmatprep.subr.bf16.mxu1 %v1782_v47 }
 0x303   :  { %1906 = vmatpush1.bf16.msra.mxu1 %v1781_v49 }
 0x304   :  { %1907 = vmatprep.subr.bf16.mxu1 %v1784_v50 }
 0x307   :  { %1908 = vmatpush1.bf16.msra.mxu1 %v1783_v51 }
 0x308   :  { %1909 = vmatprep.subr.bf16.mxu1 %v1786_v53 }
 0x30b   :  { %1910 = vmatpush1.bf16.msra.mxu1 %v1785_v55 }
 0x30c   :  { %1911 = vmatprep.subr.bf16.mxu1 %v1788_v56 }
 0x30f   :  { %1912 = vmatpush1.bf16.msra.mxu1 %v1787_v57 }
 0x310   :  { %2328 = vmatprep.subr.bf16.mxu1 %v2467_v58 }
 0x3c5   :  { %v1536_v0 = vpop.f32.mrb[4].mxu0 }
 0x3c6   :  { %v1581_v4 = vmul.f32 %v1566_v61, %v1536_v0  ;;  %v1538_v3 = vpop.f32.mrb[5].mxu0  ;;  %v2488_v0 = vld [vmem:[#allocation11 + $0x28] sm:$0xff]  }
 0x3c7   :  { %v1582_v6 = vmul.f32 %v1570_v62, %v1538_v3  ;;  %v1540_v7 = vpop.f32.mrb[6].mxu0 }
 0x3c8   :  { %v1625_v10 = vadd.f32 %v1610_v63, %v1581_v4  ;;  %v1587_v11 = vmul.f32 %v1566_v61, %v1540_v7  ;;  %v1542_v13 = vpop.f32.mrb[7].mxu0  ;;  %v2485_v61 = vld [vmem:[#allocation11 + $0x10] sm:$0xff]   ;;  %v2490_v4 = vld [vmem:[#allocation11 + $0x38] sm:$0xff]  }
 0x3c9   :  { %v1626_v14 = vadd.f32 %v1614_v2, %v1582_v6  ;;  %v1588_v15 = vmul.f32 %v1570_v62, %v1542_v13  ;;  %v2486_v62 = vld [vmem:[#allocation11 + $0x18] sm:$0xff]   ;;  %v2293_v6 = vld [vmem:[%s2901_s8] ss:$0 sm:$0xff]  ;;  %s2268_s8 = sshll.u32 %s2681_s17, 4  ;;  %s2269_s8 = int_to_ptr.vmem [resolvable:$true] %s2268_s8 }
 0x3ca   :  { %v1631_v16 = vadd.f32 %v1610_v63, %v1587_v11  ;;  %v1637_v17 = vmax.f32 %v1625_v10, 0.0  ;;  %v2487_v63 = vld [vmem:[#allocation11 + $0x20] sm:$0xff]   ;;  %s2633_s19 = scalar_lea.vmem %s2269_s8, 128  ;;  %p2638_p7 = scmp.lt.s32.totalorder %s2269_s8, %s2269_s8 }
 0x3cb   :  { %v1632_v1 = vadd.f32 %v1614_v2, %v1588_v15  ;;  %v1638_v19 = vmax.f32 %v1626_v14, 0.0  ;;  %v2489_v2 = vld [vmem:[#allocation11 + $0x30] sm:$0xff]   ;;  %p2634_p6 = scmp.ne.s32.totalorder %s2269_s8, %s2633_s19  ;;  %p2639_p8 = scmp.lt.s32.totalorder %s2633_s19, %s2633_s19 }
 0x3cc   :  { %v1643_v18 = vmax.f32 %v1631_v16, 0.0 }
 0x3cd   :  { %v1644_v8 = vmax.f32 %v1632_v1, 0.0  ;;  %p2640_p9 = por %p2639_p8, %p2638_p7 }
 0x3ce   :  { %v1793_v20 = vpack.c.bf16 %v1643_v18, %v1637_v17 }
 0x3cf   :  { %v1794_v21 = vpack.c.bf16 %v1644_v8, %v1638_v19  ;;  %v2310_v19 = vld [vmem:[%s2903_s10] ss:$0 sm:$0xff]  ;;  %p2641_p10 = pnand %p2640_p9, %p2634_p6 }
 0x3d1   :  { %1913 = vmatprep.mubr.bf16.mxu1 %v1794_v21 }
 0x3d2   :  { %1914 = vmatmul.mubr.bf16.vlgmr.msra.gmra.mrb[4].mxu1 %v1793_v20 }
 0x3d3   :  { %2329 = vmatpush3.bf16.msra.mxu1 %v2468_v22 }
 0x3d4   :  { %2330 = vmatprep.subr.bf16.mxu1 %v2469_v40 }
 0x3d7   :  { %2331 = vmatpush3.bf16.msra.mxu1 %v2470_v12 }
 0x3d8   :  { %2332 = vmatprep.subr.bf16.mxu1 %v2471_v23 }
 0x3db   :  { %2333 = vmatpush3.bf16.msra.mxu1 %v2472_v24 }
 0x3dc   :  { %2334 = vmatprep.subr.bf16.mxu1 %v2473_v25 }
 0x3df   :  { %2335 = vmatpush3.bf16.msra.mxu1 %v2474_v26 }
 0x3e0   :  { %2336 = vmatprep.subr.bf16.mxu1 %v2475_v27 }
 0x3e3   :  { %2337 = vmatpush3.bf16.msra.mxu1 %v2476_v28 }
 0x3e4   :  { %2338 = vmatprep.subr.bf16.mxu1 %v2477_v29 }
 0x3e7   :  { %2339 = vmatpush3.bf16.msra.mxu1 %v2478_v30 }
 0x3e8   :  { %2340 = vmatprep.subr.bf16.mxu1 %v2479_v31 }
 0x3eb   :  { %2341 = vmatpush3.bf16.msra.mxu1 %v2480_v32 }
 0x3ec   :  { %2342 = vmatprep.subr.bf16.mxu1 %v2481_v33 }
 0x3ef   :  { %2343 = vmatpush3.bf16.msra.mxu1 %v2482_v34 }
 0x3f0   :  { %2359 = vmatprep.subr.bf16.mxu1 %v2679_v35 }
 0x4a5   :  { %v1915_v42 = vpop.f32.mrb[4].mxu1 }
 0x4a6   :  { %v1936_v44 = vmul.f32 %v1929_v38, %v1915_v42  ;;  %v1917_v45 = vpop.f32.mrb[5].mxu1 }
 0x4a7   :  { %v1937_v46 = vmul.f32 %v1933_v39, %v1917_v45  ;;  %v1919_v47 = vpop.f32.mrb[6].mxu1 }
 0x4a8   :  { %v1952_v48 = vadd.f32 %v1945_v41, %v1936_v44  ;;  %v1938_v49 = vmul.f32 %v1929_v38, %v1919_v47  ;;  %v1921_v50 = vpop.f32.mrb[7].mxu1 }
 0x4a9   :  { %v1953_v51 = vadd.f32 %v1949_v43, %v1937_v46  ;;  %v1939_v52 = vmul.f32 %v1933_v39, %v1921_v50 }
 0x4aa   :  { %v1954_v53 = vadd.f32 %v1945_v41, %v1938_v49  ;;  %v1956_v55 = vmax.f32 %v1952_v48, 0.0 }
 0x4ab   :  { %v1955_v54 = vadd.f32 %v1949_v43, %v1939_v52  ;;  %v1957_v57 = vmax.f32 %v1953_v51, 0.0 }
 0x4ac   :  { %v1958_v56 = vmax.f32 %v1954_v53, 0.0 }
 0x4ad   :  { %v1959_v58 = vmax.f32 %v1955_v54, 0.0 }
 0x4ae   :  { %v1960_v59 = vpack.c.bf16 %v1958_v56, %v1956_v55 }
 0x4af   :  { %v1961_v5 = vpack.c.bf16 %v1959_v58, %v1957_v57 }
 0x4b1   :  { %2129 = vmatprep.mubr.bf16.mxu1 %v1961_v5 }
 0x4b2   :  { %2130 = vmatmul.mubr.bf16.vlgmr.msra.gmra.mrb[8].mxu1 %v1960_v59 }
 0x4b3   :  { %2360 = vmatpush3.bf16.msra.mxu1 %v2483_v60  ;;  %2375 = vmatprep.mubr.msk.bf16.mxu1 %vm2680_vm0, %v2679_v35 }
 0x4b4   :  { %2361 = vmatprep.subr.bf16.mxu1 %v2679_v35 }
 0x4b7   :  { %2362 = vmatpush3.bf16.msra.mxu1 %v2484_v9 }
 0x4b8   :  { %2363 = vmatprep.subr.bf16.mxu1 %v2679_v35 }
 0x4bb   :  { %2364 = vmatpush3.bf16.msra.mxu1 %v2485_v61 }
 0x4bc   :  { %2365 = vmatprep.subr.bf16.mxu1 %v2679_v35 }
 0x4bf   :  { %2366 = vmatpush3.bf16.msra.mxu1 %v2486_v62 }
 0x4c0   :  { %2367 = vmatprep.subr.bf16.mxu1 %v2679_v35 }
 0x4c3   :  { %2368 = vmatpush3.bf16.msra.mxu1 %v2487_v63 }
 0x4c4   :  { %2369 = vmatprep.subr.bf16.mxu1 %v2679_v35 }
 0x4c7   :  { %2370 = vmatpush3.bf16.msra.mxu1 %v2488_v0 }
 0x4c8   :  { %2371 = vmatprep.subr.bf16.mxu1 %v2679_v35 }
 0x4cb   :  { %2372 = vmatpush3.bf16.msra.mxu1 %v2489_v2 }
 0x4cc   :  { %2373 = vmatprep.subr.bf16.mxu1 %v2679_v35 }
 0x4cf   :  { %2374 = vmatpush3.bf16.msra.mxu1 %v2490_v4 }
 0x585   :  { %v2344_v3 = vpop.f32.mrb[8].mxu1 }
 0x586   :  { %v2345_v7 = vpop.f32.mrb[9].mxu1 }
 0x587   :  { %v2346_v10 = vadd.f32 %v2345_v7, %v2344_v3  ;;  %v2347_v11 = vpop.f32.mrb[10].mxu1 }
 0x588   :  { %v2348_v13 = vpop.f32.mrb[11].mxu1 }
 0x589   :  { %v2132_v14 = vadd.f32 %v2346_v10, %v2293_v6  ;;  %v2349_v15 = vadd.f32 %v2348_v13, %v2347_v11 }
 0x58b   :  { %v2135_v16 = vadd.f32 %v2349_v15, %v2293_v6  ;;  %v2138_v1 = vmax.f32 %v2132_v14, 0.0 }
 0x58d   :  { %v2139_v17 = vmax.f32 %v2135_v16, 0.0 }
 0x58f   :  { %v2140_v18 = vpack.c.bf16 %v2139_v17, %v2138_v1 }
 0x591   :  { %2376 = vmatmul.mubr.bf16.vlgmr.msra.gmra.mrb[12].mxu1 %v2140_v18 }
 0x664   :  { %v2246_v8 = vpop.f32.mrb[12].mxu1 }
 0x665   :  { %v2377_v20 = vpop.f32.mrb[13].mxu1  ;;  %v2247_v22 = vadd.f32 %v2310_v19, %v2246_v8 }
 0x666   :  { %v2249_v21 = vpop.f32.mrb[14].mxu1 }
 0x667   :  { %v2250_v40 = vadd.f32 %v2310_v19, %v2249_v21  ;;  %v2378_v12 = vpop.f32.mrb[15].mxu1 }
 0x669   :  { %v2326_v23 = vpack.c.bf16 %v2250_v40, %v2247_v22 }
 0x66b   :  { %2327 = vst [vmem:[#allocation13] sm:$0xff] %v2326_v23  }
 0x66c   :  { %2644 = shalt.err (!%p2641_p10)
}
 0x66d   :  { %s2645_s22 = scalar_lea.hbm %s2904_s11, 128 }
 0x66e   :  { %p2646_p11 = scmp.ne.s32.totalorder %s2904_s11, %s2645_s22  ;;  %p2649_p12 = scmp.lt.u32.totalorder %s2645_s22, %s2904_s11 }
 0x670   :  { %p2651_p13 = pnand %p2649_p12, %p2646_p11 }
 0x672   :  { %2654 = shalt.err (!%p2651_p13)
}
 0x673   :  { %2274 = dma.vmem_to_hbm [thread:$0]  %s2269_s8, 128, %s2904_s11, [#allocation4], %s2676_s3, %s2676_s3, %s2677_s20  }
 0x674   :  { %2663 = dma.done.wait [#allocation4], 128  }
 0x675   :  { %2664 = vsyncadd [#allocation4], 4294967168 }
 0x676   :  { %2278 = vsyncpa [#allocation3], 1 }
 0x677   :  { %2279 = vsyncpa [#allocation6], 1 }
 0x678   :  { %2280 = vsyncpa [#allocation9], 1 }
 0x679   :  { %2281 = vsyncpa [#allocation12], 1 }
 0x67a   :  { %2282 = vsyncpa [#allocation4], 1 }

</bundles_post_ra>
